<compile_context>
chip_gen: v5e
topology: v5e:2x2
jax: 0.10.0
libtpu: 0.0.40
codegen_flags: <defaults>
</compile_context>

<pallas_src>
import math

import jax
import jax.numpy as jnp
from jax import lax
from jax.experimental import pallas as pl
from jax.experimental.pallas import tpu as pltpu

IMG_SIZE = 28 * 28        # 784
H1 = 512
H2 = 256
OUT = 1


def _leaky_relu(x, slope=0.2):
    return jnp.where(x >= 0, x, slope * x)


def _discriminator_kernel(x_ref, w1_ref, b1_ref, w2_ref, b2_ref,
                          w3_ref, b3_ref, o_ref):
    # x tile (TB, 784) f32 -> bf16 cast in-kernel (no wrapper pad/cast pass).
    x = x_ref[...].astype(jnp.bfloat16)

    h1 = jnp.dot(x, w1_ref[...], preferred_element_type=jnp.float32)
    h1 = _leaky_relu(h1 + b1_ref[...])                          # (TB, 512) f32

    h2 = jnp.dot(h1.astype(jnp.bfloat16), w2_ref[...],
                 preferred_element_type=jnp.float32)
    h2 = _leaky_relu(h2 + b2_ref[...])                          # (TB, 256) f32

    # Final layer, transposed:  w3 (1,256) contracted with h2 (TB,256) along
    # the feature dim -> (1, TB) lane-dense logit row (batch maps to lanes).
    logits = lax.dot_general(
        w3_ref[...], h2.astype(jnp.bfloat16),
        dimension_numbers=(((1,), (1,)), ((), ())),
        preferred_element_type=jnp.float32)                     # (1, TB)

    o_ref[...] = jax.nn.sigmoid(logits + b3_ref[0])             # tiny writeback


def prepare_params(params):
    """One-time cast/layout of f32 (in, out)-layout params to kernel layout."""
    w1, b1, w2, b2, w3, b3 = params
    return (w1.astype(jnp.bfloat16),                 # (784, 512)
            b1.astype(jnp.float32),                  # (1, 512)
            w2.astype(jnp.bfloat16),                 # (512, 256)
            b2.astype(jnp.float32),                  # (1, 256)
            w3.astype(jnp.bfloat16).T,               # (1, 256)  trans_b form
            b3.astype(jnp.float32).reshape(1))       # (1,) scalar -> SMEM


def _batch_tile(batch):
    # Large batches: big tiles to amortize ~0.35us/step overhead, but keep at
    # least 2 grid steps so both v7x TensorCores get work.  Multiples of
    # 256/128 match the v6e/v7x and v5e MXU tile sizes.
    for tb in (1024, 512, 256, 128):
        if batch >= 2 * tb:
            return tb
    # Small batch: single tile, rounded up to bf16 sublane packing (16 rows).
    return max(16, ((batch + 15) // 16) * 16)


def discriminator_forward(img, prepared_params):
    """img: (B, C, H, W) float32 with C*H*W == 784. Returns (B, 1) float32."""
    w1, b1, w2, b2, w3, b3 = prepared_params
    batch = img.shape[0]
    x = img.reshape(batch, -1)                       # torch .view semantics
    assert x.shape[1] == IMG_SIZE

    tb = _batch_tile(batch)
    num_tiles = pl.cdiv(batch, tb)

    # Weights/biases: constant index_map -> stay VMEM resident across steps.
    resident = lambda shape: pl.BlockSpec(shape, lambda i: (0, 0))

    flops = 2 * batch * (IMG_SIZE * H1 + H1 * H2 + H2 * OUT)
    bytes_accessed = (batch * IMG_SIZE * 4
                      + (w1.size + w2.size + w3.size) * 2
                      + (b1.size + b2.size + b3.size) * 4
                      + num_tiles * tb * 4)

    out = pl.pallas_call(
        _discriminator_kernel,
        out_shape=jax.ShapeDtypeStruct((num_tiles, tb), jnp.float32),
        grid=(num_tiles,),
        in_specs=[
            pl.BlockSpec((tb, IMG_SIZE), lambda i: (i, 0)),   # raw f32 input tile
            resident((IMG_SIZE, H1)), resident((1, H1)),
            resident((H1, H2)), resident((1, H2)),
            resident((1, H2)),                                # w3 (1, 256)
            pl.BlockSpec(memory_space=pltpu.MemorySpace.SMEM),  # b3 scalar
        ],
        out_specs=pl.BlockSpec((1, tb), lambda i: (i, 0)),    # transposed logits
        compiler_params=pltpu.CompilerParams(
            dimension_semantics=("parallel",)),               # v7x dual-TC sharding
        cost_estimate=pl.CostEstimate(
            flops=flops,
            transcendentals=batch,
            bytes_accessed=bytes_accessed),
    )(x, w1, b1, w2, b2, w3, b3)

    # (num_tiles, tb) -> (B, 1); garbage lanes from the ragged last tile are
    # sliced away here (row-independent, so this is safe).
    return out.reshape(num_tiles * tb)[:batch].reshape(batch, OUT)


def init_params(key):
    """Deterministic init mimicking torch.nn.Linear default U[-1/sqrt(fan_in), +]."""
    def linear(key, fan_in, fan_out):
        kw, kb = jax.random.split(key)
        bound = 1.0 / math.sqrt(fan_in)
        w = jax.random.uniform(kw, (fan_in, fan_out), jnp.float32, -bound, bound)
        b = jax.random.uniform(kb, (1, fan_out), jnp.float32, -bound, bound)
        return w, b

    k1, k2, k3 = jax.random.split(key, 3)
    w1, b1 = linear(k1, IMG_SIZE, H1)
    w2, b2 = linear(k2, H1, H2)
    w3, b3 = linear(k3, H2, OUT)
    return (w1, b1, w2, b2, w3, b3)


def _reference_forward(img, params):
    w1, b1, w2, b2, w3, b3 = params
    x = img.reshape(img.shape[0], -1)
    h1 = x @ w1 + b1
    h1 = jnp.where(h1 >= 0, h1, 0.2 * h1)
    h2 = h1 @ w2 + b2
    h2 = jnp.where(h2 >= 0, h2, 0.2 * h2)
    return jax.nn.sigmoid(h2 @ w3 + b3)


if __name__ == "__main__":
    key = jax.random.PRNGKey(0)
    k_param, k_img = jax.random.split(key)

    params = init_params(k_param)
    prepared = prepare_params(params)        # bf16 weights live in HBM

    # Small batch, MNIST-like NCHW input (B=2, C=1, H=28, W=28).
    img = jax.random.normal(k_img, (2, 1, 28, 28), jnp.float32)

    out = discriminator_forward(img, prepared)
    out = jax.block_until_ready(out)

    ref = _reference_forward(img, params)    # f32 reference
    assert out.shape == (2, 1)
    # bf16 matmul operands (f32 accumulation) -> loosened tolerance vs f32 ref.
    assert jnp.allclose(out, ref, atol=2e-2, rtol=2e-2), (out, ref)

    print("KERNEL_OK")
</pallas_src>

<mosaic_0001>
module attributes {stable_mosaic.version = 11 : i64} {
  func.func @_discriminator_kernel(%arg0: i32, %arg1: memref<16x784xf32, #tpu.memory_space<vmem>>, %arg2: memref<784x512xbf16, #tpu.memory_space<vmem>>, %arg3: memref<1x512xf32, #tpu.memory_space<vmem>>, %arg4: memref<512x256xbf16, #tpu.memory_space<vmem>>, %arg5: memref<1x256xf32, #tpu.memory_space<vmem>>, %arg6: memref<1x256xbf16, #tpu.memory_space<vmem>>, %arg7: memref<1xf32, #tpu.memory_space<smem>>, %arg8: memref<1x16xf32, #tpu.memory_space<vmem>>) attributes {dimension_semantics = [#tpu.dimension_semantics<parallel>], iteration_bounds = array<i64: 1>, scalar_prefetch = 0 : i64, scratch_operands = 0 : i64, tpu.core_type = #tpu.core_type<tc>, window_params = [{transform_indices = @transform_0, window_bounds = array<i64: 16, 784>}, {pipeline_mode = #tpu.pipeline_mode<synchronous>, transform_indices = @transform_1, window_bounds = array<i64: 784, 512>}, {pipeline_mode = #tpu.pipeline_mode<synchronous>, transform_indices = @transform_2, window_bounds = array<i64: 1, 512>}, {pipeline_mode = #tpu.pipeline_mode<synchronous>, transform_indices = @transform_3, window_bounds = array<i64: 512, 256>}, {pipeline_mode = #tpu.pipeline_mode<synchronous>, transform_indices = @transform_4, window_bounds = array<i64: 1, 256>}, {pipeline_mode = #tpu.pipeline_mode<synchronous>, transform_indices = @transform_5, window_bounds = array<i64: 1, 256>}, {transform_indices = @transform_6, window_bounds = array<i64: 1>}, {transform_indices = @transform_7, window_bounds = array<i64: 1, 16>}]} {
    %c0 = arith.constant 0 : index
    %c0_0 = arith.constant 0 : index
    %0 = vector.load %arg1[%c0, %c0_0] : memref<16x784xf32, #tpu.memory_space<vmem>>, vector<16x784xf32>
    %1 = arith.truncf %0 : vector<16x784xf32> to vector<16x784xbf16>
    %c0_1 = arith.constant 0 : index
    %c0_2 = arith.constant 0 : index
    %2 = vector.load %arg2[%c0_1, %c0_2] : memref<784x512xbf16, #tpu.memory_space<vmem>>, vector<784x512xbf16>
    %cst = arith.constant dense<0.000000e+00> : vector<16x512xf32>
    %3 = tpu.matmul %1, %2, %cst {dimension_numbers = #tpu.dot_dimension_numbers<[1], [0], [0], [1], [0, 0, 1, 1], [], []>} : vector<16x784xbf16>, vector<784x512xbf16>, vector<16x512xf32> -> vector<16x512xf32>
    %c0_3 = arith.constant 0 : index
    %c0_4 = arith.constant 0 : index
    %4 = vector.load %arg3[%c0_3, %c0_4] : memref<1x512xf32, #tpu.memory_space<vmem>>, vector<1x512xf32>
    %5 = vector.broadcast %4 : vector<1x512xf32> to vector<16x512xf32>
    %6 = arith.addf %3, %5 : vector<16x512xf32>
    %cst_5 = arith.constant 0.000000e+00 : f32
    %7 = vector.broadcast %cst_5 : f32 to vector<16x512xf32>
    %8 = arith.cmpf oge, %6, %7 : vector<16x512xf32>
    %cst_6 = arith.constant 2.000000e-01 : f32
    %9 = vector.broadcast %cst_6 : f32 to vector<16x512xf32>
    %10 = arith.mulf %9, %6 : vector<16x512xf32>
    %11 = arith.select %8, %6, %10 : vector<16x512xi1>, vector<16x512xf32>
    %12 = arith.truncf %11 : vector<16x512xf32> to vector<16x512xbf16>
    %c0_7 = arith.constant 0 : index
    %c0_8 = arith.constant 0 : index
    %13 = vector.load %arg4[%c0_7, %c0_8] : memref<512x256xbf16, #tpu.memory_space<vmem>>, vector<512x256xbf16>
    %cst_9 = arith.constant dense<0.000000e+00> : vector<16x256xf32>
    %14 = tpu.matmul %12, %13, %cst_9 {dimension_numbers = #tpu.dot_dimension_numbers<[1], [0], [0], [1], [0, 0, 1, 1], [], []>} : vector<16x512xbf16>, vector<512x256xbf16>, vector<16x256xf32> -> vector<16x256xf32>
    %c0_10 = arith.constant 0 : index
    %c0_11 = arith.constant 0 : index
    %15 = vector.load %arg5[%c0_10, %c0_11] : memref<1x256xf32, #tpu.memory_space<vmem>>, vector<1x256xf32>
    %16 = vector.broadcast %15 : vector<1x256xf32> to vector<16x256xf32>
    %17 = arith.addf %14, %16 : vector<16x256xf32>
    %cst_12 = arith.constant 0.000000e+00 : f32
    %18 = vector.broadcast %cst_12 : f32 to vector<16x256xf32>
    %19 = arith.cmpf oge, %17, %18 : vector<16x256xf32>
    %cst_13 = arith.constant 2.000000e-01 : f32
    %20 = vector.broadcast %cst_13 : f32 to vector<16x256xf32>
    %21 = arith.mulf %20, %17 : vector<16x256xf32>
    %22 = arith.select %19, %17, %21 : vector<16x256xi1>, vector<16x256xf32>
    %c0_14 = arith.constant 0 : index
    %c0_15 = arith.constant 0 : index
    %23 = vector.load %arg6[%c0_14, %c0_15] : memref<1x256xbf16, #tpu.memory_space<vmem>>, vector<1x256xbf16>
    %24 = arith.truncf %22 : vector<16x256xf32> to vector<16x256xbf16>
    %cst_16 = arith.constant dense<0.000000e+00> : vector<1x16xf32>
    %25 = tpu.matmul %23, %24, %cst_16 {dimension_numbers = #tpu.dot_dimension_numbers<[1], [1], [0], [0], [0, 0, 1, 0], [], []>} : vector<1x256xbf16>, vector<16x256xbf16>, vector<1x16xf32> -> vector<1x16xf32>
    %c0_17 = arith.constant 0 : index
    %26 = memref.load %arg7[%c0_17] : memref<1xf32, #tpu.memory_space<smem>>
    %27 = vector.broadcast %26 : f32 to vector<1x16xf32>
    %28 = arith.addf %25, %27 : vector<1x16xf32>
    %29 = arith.negf %28 : vector<1x16xf32>
    %30 = math.exp %29 : vector<1x16xf32>
    %cst_18 = arith.constant 1.000000e+00 : f32
    %31 = vector.broadcast %cst_18 : f32 to vector<1x16xf32>
    %32 = arith.addf %31, %30 : vector<1x16xf32>
    %33 = arith.divf %31, %32 : vector<1x16xf32>
    %c0_19 = arith.constant 0 : index
    %c0_20 = arith.constant 0 : index
    %34 = vector.load %arg8[%c0_19, %c0_20] : memref<1x16xf32, #tpu.memory_space<vmem>>, vector<1x16xf32>
    tpu.vector_store %arg8[%c0_19, %c0_20], %33 {strides = array<i32>} : memref<1x16xf32, #tpu.memory_space<vmem>>, vector<1x16xf32>,
    return
  }
  func.func @transform_0(%arg0: i32) -> (i32, i32) {
    %c0_i32 = arith.constant 0 : i32
    %c0_i32_0 = arith.constant 0 : i32
    return %arg0, %c0_i32 : i32, i32
  }
  func.func @transform_1(%arg0: i32) -> (i32, i32) {
    %c0_i32 = arith.constant 0 : i32
    %c0_i32_0 = arith.constant 0 : i32
    %c0_i32_1 = arith.constant 0 : i32
    return %c0_i32, %c0_i32_0 : i32, i32
  }
  func.func @transform_2(%arg0: i32) -> (i32, i32) {
    %c0_i32 = arith.constant 0 : i32
    %c0_i32_0 = arith.constant 0 : i32
    %c0_i32_1 = arith.constant 0 : i32
    return %c0_i32, %c0_i32_0 : i32, i32
  }
  func.func @transform_3(%arg0: i32) -> (i32, i32) {
    %c0_i32 = arith.constant 0 : i32
    %c0_i32_0 = arith.constant 0 : i32
    %c0_i32_1 = arith.constant 0 : i32
    return %c0_i32, %c0_i32_0 : i32, i32
  }
  func.func @transform_4(%arg0: i32) -> (i32, i32) {
    %c0_i32 = arith.constant 0 : i32
    %c0_i32_0 = arith.constant 0 : i32
    %c0_i32_1 = arith.constant 0 : i32
    return %c0_i32, %c0_i32_0 : i32, i32
  }
  func.func @transform_5(%arg0: i32) -> (i32, i32) {
    %c0_i32 = arith.constant 0 : i32
    %c0_i32_0 = arith.constant 0 : i32
    %c0_i32_1 = arith.constant 0 : i32
    return %c0_i32, %c0_i32_0 : i32, i32
  }
  func.func @transform_6(%arg0: i32) -> i32 {
    %c0_i32 = arith.constant 0 : i32
    %c0_i32_0 = arith.constant 0 : i32
    return %c0_i32 : i32
  }
  func.func @transform_7(%arg0: i32) -> (i32, i32) {
    %c0_i32 = arith.constant 0 : i32
    %c0_i32_0 = arith.constant 0 : i32
    return %arg0, %c0_i32 : i32, i32
  }
}

</mosaic_0001>

<bundles_post_ra>
// kernel: tpu_custom_call.1
= control target key start
LH: loop header
LB: loop body
LE: loop exit
PB: predicated region body
PF: predicated region fallthrough
CT: control target
= control target key end

     0   :  { %13 = vsyncpa [#allocation4], 0  ;;  %s3966_s0 = inlined_call_operand.hbm [shape: f32[2,784], index: 0, kind: input, shape index: {}]   ;;  %s3967_s1 = inlined_call_operand.hbm [shape: bf16[784,512], index: 1, kind: input, shape index: {}]   ;;  %s3968_s2 = inlined_call_operand.hbm [shape: f32[1,512], index: 2, kind: input, shape index: {}]   ;;  %s3969_s3 = inlined_call_operand.hbm [shape: bf16[512,256], index: 3, kind: input, shape index: {}]   ;;  %s3970_s4 = inlined_call_operand.vmem [shape: f32[1,256], index: 4, kind: input, shape index: {}]   ;;  %s3971_s5 = inlined_call_operand.vmem [shape: bf16[1,256], index: 5, kind: input, shape index: {}]   ;;  %s3972_s6 = inlined_call_operand.<no memory space> [shape: f32[1], index: 6, kind: input, shape index: {}]   ;;  %s3973_s7 = inlined_call_operand.hbm [shape: f32[1,16], index: 7, kind: output, shape index: {}]  }
   0x1   :  { %14 = vsyncpa [#allocation7], 0 }
   0x2   :  { %15 = vsyncpa [#allocation10], 0 }
   0x3   :  { %16 = vsyncpa [#allocation5], 0  ;;  %s34_s26 = sshll.u32 %s3967_s1, 4  ;;  %s35_s26 = int_to_ptr.hbm [resolvable:$true] %s34_s26 }
   0x4   :  { %20 = vsyncadd [#allocation4], 1568  ;;  %s3829_s27 = smov [#allocation6]   ;;  %s21_s8 = sshll.u32 %s3966_s0, 4  ;;  %s22_s8 = int_to_ptr.hbm [resolvable:$true] %s21_s8 }
   0x5   :  { %s36_s28 = sshll.u32 %s3829_s27, 4  ;;  %s3830_s9 = smov 256   ;;  %s37_s28 = int_to_ptr.vmem [resolvable:$true] %s36_s28 }
   0x6   :  { %s3831_s10 = smov 16   ;;  %s3832_s11 = smov [#allocation3]  }
   0x7   :  { %42 = dma.hbm_to_vmem [thread:$0]  %s35_s26, 25088, %s37_s28, [#allocation7], %s3830_s9, %s3830_s9, %s3831_s10  }
   0x8   :  { %s23_s12 = sshll.u32 %s3832_s11, 4  ;;  %s3833_s13 = smov 224   ;;  %s24_s12 = int_to_ptr.vmem [resolvable:$true] %s23_s12 }
   0x9   :  { %s3834_s14 = smov 14   ;;  %s48_s16 = sshll.u32 %s3968_s2, 4  ;;  %s49_s16 = int_to_ptr.hbm [resolvable:$true] %s48_s16 }
   0xa   :  { %29 = dma.hbm_to_vmem [thread:$0]  %s22_s8, 224, %s24_s12, [#allocation4], %s3833_s13, %s3833_s13, %s3834_s14  }
   0xb   :  { %s3835_s17 = smov [#allocation8]   ;;  %s58_s20 = sshll.u32 %s3969_s3, 4  ;;  %s59_s20 = int_to_ptr.hbm [resolvable:$true] %s58_s20 }
   0xc   :  { %s50_s18 = sshll.u32 %s3835_s17, 4  ;;  %s3836_s21 = smov [#allocation9]   ;;  %s51_s18 = int_to_ptr.vmem [resolvable:$true] %s50_s18 }
   0xd   :  { %53 = dma.hbm_to_vmem [thread:$0]  %s49_s16, 64, %s51_s18, [#allocation7]  }
   0xe   :  { %s60_s22 = sshll.u32 %s3836_s21, 4  ;;  %s3837_s23 = smov 128   ;;  %s61_s22 = int_to_ptr.vmem [resolvable:$true] %s60_s22 }
   0xf   :  { %s3838_s24 = smov 8  }
  0x10   :  { %66 = dma.hbm_to_vmem [thread:$0]  %s59_s20, 8192, %s61_s22, [#allocation10], %s3837_s23, %s3837_s23, %s3838_s24  }
  0x11   :  { %3821 = dma.done.wait [#allocation4], 1792  }
  0x12   :  { %3822 = vsyncadd [#allocation4], 4294965504 }
  0x13   :  { %3823 = dma.done.wait [#allocation7], 25152  }
  0x14   :  { %3824 = vsyncadd [#allocation7], 4294942144 }
  0x15   :  { %3825 = dma.done.wait [#allocation10], 8192  }
  0x16   :  { %3826 = vsyncadd [#allocation10], 4294959104  ;;  %v2495_v0 = vld [vmem:[#allocation6 + $0xe0] sm:$0xf]  ;;  %v3456_v1 = vld [vmem:[#allocation6 + $0xec] sm:$0xf0] }
  0x17   :  { %v2623_v2 = vld [vmem:[#allocation6 + $0x1e0] sm:$0xf]  ;;  %v2496_v3 = vor.u32 %v3456_v1, %v2495_v0  ;;  %v3488_v4 = vld [vmem:[#allocation6 + $0x1ec] sm:$0xf0]  ;;  %vm1366_vm0 = vcmask 130048   ;;  %s3839_s27 = smov [#allocation11]  }
  0x18   :  { %v2751_v5 = vld [vmem:[#allocation6 + $0x2e0] sm:$0xf]  ;;  %v3520_v6 = vld [vmem:[#allocation6 + $0x2ec] sm:$0xf0]  ;;  %v2624_v7 = vor.u32 %v3488_v4, %v2623_v2  ;;  %s2367_s28 = sshll.u32 %s3839_s27, 4  ;;  %s2369_s30 = sshll.u32 %s3973_s7, 4  ;;  %s2368_s28 = int_to_ptr.vmem [resolvable:$true] %s2367_s28  ;;  %s2370_s30 = int_to_ptr.hbm [resolvable:$true] %s2369_s30 }
  0x19   :  { %v2752_v8 = vor.u32 %v3520_v6, %v2751_v5  ;;  %v2879_v9 = vld [vmem:[#allocation6 + $0x3e0] sm:$0xf]  ;;  %v3552_v10 = vld [vmem:[#allocation6 + $0x3ec] sm:$0xf0]  ;;  %1370 = vmatpush.bf16.msra.mxu0 %v2496_v3 }
  0x1a   :  { %v2479_v11 = vld [vmem:[#allocation6 + $0xc0] sm:$0xf]  ;;  %v2880_v12 = vor.u32 %v3552_v10, %v2879_v9  ;;  %v3452_v13 = vld [vmem:[#allocation6 + $0xcc] sm:$0xf0]  ;;  %1384 = vmatpush.bf16.msra.mxu1 %v2624_v7 }
  0x1b   :  { %v2607_v14 = vld [vmem:[#allocation6 + $0x1c0] sm:$0xf]  ;;  %v3484_v15 = vld [vmem:[#allocation6 + $0x1cc] sm:$0xf0]  ;;  %1398 = vmatpush.bf16.msra.mxu2 %v2752_v8  ;;  %v2480_v16 = vor.u32 %v3452_v13, %v2479_v11 }
  0x1c   :  { %v2608_v17 = vor.u32 %v3484_v15, %v2607_v14  ;;  %v2735_v18 = vld [vmem:[#allocation6 + $0x2c0] sm:$0xf]  ;;  %v3516_v19 = vld [vmem:[#allocation6 + $0x2cc] sm:$0xf0]  ;;  %1412 = vmatpush.bf16.msra.mxu3 %v2880_v12 }
  0x1d   :  { %v2863_v20 = vld [vmem:[#allocation6 + $0x3c0] sm:$0xf]  ;;  %v2736_v21 = vor.u32 %v3516_v19, %v2735_v18  ;;  %v3548_v22 = vld [vmem:[#allocation6 + $0x3cc] sm:$0xf0]  ;;  %1371 = vmatpush.bf16.msra.mxu0 %v2480_v16 }
  0x1e   :  { %v2463_v23 = vld [vmem:[#allocation6 + $0xa0] sm:$0xf]  ;;  %v3448_v24 = vld [vmem:[#allocation6 + $0xac] sm:$0xf0]  ;;  %v2864_v25 = vor.u32 %v3548_v22, %v2863_v20  ;;  %1385 = vmatpush.bf16.msra.mxu1 %v2608_v17 }
  0x1f   :  { %v2591_v26 = vld [vmem:[#allocation6 + $0x1a0] sm:$0xf]  ;;  %v3480_v27 = vld [vmem:[#allocation6 + $0x1ac] sm:$0xf0]  ;;  %v2464_v29 = vor.u32 %v3448_v24, %v2463_v23  ;;  %1399 = vmatpush.bf16.msra.mxu2 %v2736_v21 }
  0x20   :  { %v2719_v28 = vld [vmem:[#allocation6 + $0x2a0] sm:$0xf]  ;;  %v3512_v30 = vld [vmem:[#allocation6 + $0x2ac] sm:$0xf0]  ;;  %v2592_v33 = vor.u32 %v3480_v27, %v2591_v26  ;;  %1413 = vmatpush.bf16.msra.mxu3 %v2864_v25 }
  0x21   :  { %v2847_v31 = vld [vmem:[#allocation6 + $0x3a0] sm:$0xf]  ;;  %v3544_v32 = vld [vmem:[#allocation6 + $0x3ac] sm:$0xf0]  ;;  %v2720_v34 = vor.u32 %v3512_v30, %v2719_v28  ;;  %1372 = vmatpush.bf16.msra.mxu0 %v2464_v29 }
  0x22   :  { %v2447_v35 = vld [vmem:[#allocation6 + $0x80] sm:$0xf]  ;;  %v3444_v36 = vld [vmem:[#allocation6 + $0x8c] sm:$0xf0]  ;;  %v2848_v38 = vor.u32 %v3544_v32, %v2847_v31  ;;  %1386 = vmatpush.bf16.msra.mxu1 %v2592_v33 }
  0x23   :  { %v2575_v37 = vld [vmem:[#allocation6 + $0x180] sm:$0xf]  ;;  %v3476_v39 = vld [vmem:[#allocation6 + $0x18c] sm:$0xf0]  ;;  %v2448_v44 = vor.u32 %v3444_v36, %v2447_v35  ;;  %1400 = vmatpush.bf16.msra.mxu2 %v2720_v34 }
  0x24   :  { %v2703_v40 = vld [vmem:[#allocation6 + $0x280] sm:$0xf]  ;;  %v3508_v41 = vld [vmem:[#allocation6 + $0x28c] sm:$0xf0]  ;;  %v2576_v45 = vor.u32 %v3476_v39, %v2575_v37  ;;  %1414 = vmatpush.bf16.msra.mxu3 %v2848_v38  ;;  %v3454_v37 = vld [vmem:[#allocation6 + $0xe4] sm:$0xf] }
  0x25   :  { %v2831_v42 = vld [vmem:[#allocation6 + $0x380] sm:$0xf]  ;;  %v3540_v43 = vld [vmem:[#allocation6 + $0x38c] sm:$0xf0]  ;;  %v2704_v46 = vor.u32 %v3508_v41, %v2703_v40  ;;  %1373 = vmatpush.bf16.msra.mxu0 %v2448_v44  ;;  %v2497_v38 = vld [vmem:[#allocation6 + $0xf0] sm:$0xf0] }
  0x26   :  { %v2431_v47 = vld [vmem:[#allocation6 + $0x60] sm:$0xf]  ;;  %v3440_v48 = vld [vmem:[#allocation6 + $0x6c] sm:$0xf0]  ;;  %v2832_v50 = vor.u32 %v3540_v43, %v2831_v42  ;;  %1387 = vmatpush.bf16.msra.mxu1 %v2576_v45 }
  0x27   :  { %v2559_v49 = vld [vmem:[#allocation6 + $0x160] sm:$0xf]  ;;  %v3472_v51 = vld [vmem:[#allocation6 + $0x16c] sm:$0xf0]  ;;  %v2432_v56 = vor.u32 %v3440_v48, %v2431_v47  ;;  %1401 = vmatpush.bf16.msra.mxu2 %v2704_v46  ;;  %v2500_v46 = vor.u32 %v3454_v37, %v2497_v38 }
  0x28   :  { %v2687_v52 = vld [vmem:[#allocation6 + $0x260] sm:$0xf]  ;;  %v3504_v53 = vld [vmem:[#allocation6 + $0x26c] sm:$0xf0]  ;;  %v2560_v57 = vor.u32 %v3472_v51, %v2559_v49  ;;  %1415 = vmatpush.bf16.msra.mxu3 %v2832_v50  ;;  %v98_v50 = vld [vmem:[#allocation3 + $0x38] sm:$0xff] }
  0x29   :  { %v2815_v54 = vld [vmem:[#allocation6 + $0x360] sm:$0xf]  ;;  %v3536_v55 = vld [vmem:[#allocation6 + $0x36c] sm:$0xf0]  ;;  %v2688_v58 = vor.u32 %v3504_v53, %v2687_v52  ;;  %1374 = vmatpush.bf16.msra.mxu0 %v2432_v56  ;;  %v3450_v53 = vld [vmem:[#allocation6 + $0xc4] sm:$0xf] }
  0x2a   :  { %v2415_v59 = vld [vmem:[#allocation6 + $0x40] sm:$0xf]  ;;  %v3436_v60 = vld [vmem:[#allocation6 + $0x4c] sm:$0xf0]  ;;  %v2816_v62 = vor.u32 %v3536_v55, %v2815_v54  ;;  %1388 = vmatpush.bf16.msra.mxu1 %v2560_v57  ;;  %v2481_v54 = vld [vmem:[#allocation6 + $0xd0] sm:$0xf0] }
  0x2b   :  { %v2543_v61 = vld [vmem:[#allocation6 + $0x140] sm:$0xf]  ;;  %v3468_v63 = vld [vmem:[#allocation6 + $0x14c] sm:$0xf0]  ;;  %v2416_v4 = vor.u32 %v3436_v60, %v2415_v59  ;;  %1402 = vmatpush.bf16.msra.mxu2 %v2688_v58  ;;  %v100_v55 = vld [vmem:[#allocation3 + $0x46] sm:$0xff] }
  0x2c   :  { %v2671_v0 = vld [vmem:[#allocation6 + $0x240] sm:$0xf]  ;;  %v3500_v1 = vld [vmem:[#allocation6 + $0x24c] sm:$0xf0]  ;;  %v2544_v6 = vor.u32 %v3468_v63, %v2543_v61  ;;  %1416 = vmatpush.bf16.msra.mxu3 %v2816_v62  ;;  %v102_v58 = vld [vmem:[#allocation3 + $0x54] sm:$0xff] }
  0x2d   :  { %v2799_v2 = vld [vmem:[#allocation6 + $0x340] sm:$0xf]  ;;  %v3532_v3 = vld [vmem:[#allocation6 + $0x34c] sm:$0xf0]  ;;  %v2672_v7 = vor.u32 %v3500_v1, %v2671_v0  ;;  %1375 = vmatpush.bf16.msra.mxu0 %v2416_v4  ;;  %v3446_v62 = vld [vmem:[#allocation6 + $0xa4] sm:$0xf] }
  0x2e   :  { %v2399_v5 = vld [vmem:[#allocation6 + $0x20] sm:$0xf]  ;;  %v3432_v8 = vld [vmem:[#allocation6 + $0x2c] sm:$0xf0]  ;;  %v2800_v11 = vor.u32 %v3532_v3, %v2799_v2  ;;  %1389 = vmatpush.bf16.msra.mxu1 %v2544_v6  ;;  %v2465_v63 = vld [vmem:[#allocation6 + $0xb0] sm:$0xf0]  ;;  %v2484_v3 = vor.u32 %v3450_v53, %v2481_v54 }
  0x2f   :  { %v2527_v9 = vld [vmem:[#allocation6 + $0x120] sm:$0xf]  ;;  %v3464_v10 = vld [vmem:[#allocation6 + $0x12c] sm:$0xf0]  ;;  %v2400_v18 = vor.u32 %v3432_v8, %v2399_v5  ;;  %1403 = vmatpush.bf16.msra.mxu2 %v2672_v7  ;;  %v95_v53 = vld [vmem:[#allocation3 + $0x24] sm:$0x3f] }
  0x30   :  { %v2655_v12 = vld [vmem:[#allocation6 + $0x220] sm:$0xf]  ;;  %v3496_v13 = vld [vmem:[#allocation6 + $0x22c] sm:$0xf0]  ;;  %v2528_v25 = vor.u32 %v3464_v10, %v2527_v9  ;;  %1417 = vmatpush.bf16.msra.mxu3 %v2800_v11  ;;  %v2468_v11 = vor.u32 %v3446_v62, %v2465_v63  ;;  %v2401_v62 = vld [vmem:[#allocation6 + $0x30] sm:$0xf0] }
  0x31   :  { %v2783_v14 = vld [vmem:[#allocation6 + $0x320] sm:$0xf]  ;;  %v3528_v15 = vld [vmem:[#allocation6 + $0x32c] sm:$0xf0]  ;;  %v2656_v26 = vor.u32 %v3496_v13, %v2655_v12  ;;  %1376 = vmatpush.bf16.msra.mxu0 %v2400_v18  ;;  %134 = vst [vmem:[#allocation1 + $0x22] ss:$4 sm:$0xff] %v95_v53 }
  0x32   :  { %v2383_v16 = vld [vmem:[#allocation6] sm:$0xf]  ;;  %v3428_v17 = vld [vmem:[#allocation6 + $0xc] sm:$0xf0]  ;;  %v2784_v31 = vor.u32 %v3528_v15, %v2783_v14  ;;  %1390 = vmatpush.bf16.msra.mxu1 %v2528_v25  ;;  %v3442_v14 = vld [vmem:[#allocation6 + $0x84] sm:$0xf] }
  0x33   :  { %v2511_v19 = vld [vmem:[#allocation6 + $0x100] sm:$0xf]  ;;  %v3460_v20 = vld [vmem:[#allocation6 + $0x10c] sm:$0xf0]  ;;  %v2384_v36 = vor.u32 %v3428_v17, %v2383_v16  ;;  %1404 = vmatpush.bf16.msra.mxu2 %v2656_v26  ;;  %v2449_v15 = vld [vmem:[#allocation6 + $0x90] sm:$0xf0] }
  0x34   :  { %v2639_v21 = vld [vmem:[#allocation6 + $0x200] sm:$0xf]  ;;  %v3492_v22 = vld [vmem:[#allocation6 + $0x20c] sm:$0xf0]  ;;  %v2512_v39 = vor.u32 %v3460_v20, %v2511_v19  ;;  %1418 = vmatpush.bf16.msra.mxu3 %v2784_v31  ;;  %v2452_v18 = vor.u32 %v3442_v14, %v2449_v15  ;;  %v3486_v19 = vld [vmem:[#allocation6 + $0x1e4] sm:$0xf] }
  0x35   :  { %v90_v23 = vld [vmem:[#allocation3] sm:$0xff]  ;;  %v92_v24 = vld [vmem:[#allocation3 + $0xe] sm:$0xff]  ;;  %v2640_v40 = vor.u32 %v3492_v22, %v2639_v21  ;;  %1377 = vmatpush.bf16.msra.mxu0 %v2384_v36 }
  0x36   :  { %v2767_v27 = vld [vmem:[#allocation6 + $0x300] sm:$0xf]  ;;  %v3524_v28 = vld [vmem:[#allocation6 + $0x30c] sm:$0xf0]  ;;  %122 = vst [vmem:[#allocation1] ss:$4 sm:$0xff] %v90_v23  ;;  %1391 = vmatpush.bf16.msra.mxu1 %v2512_v39 }
  0x37   :  { %v94_v29 = vld [vmem:[#allocation3 + $0x1c] sm:$0xff]  ;;  %v96_v30 = vld [vmem:[#allocation3 + $0x2a] sm:$0xff]  ;;  %124 = vst [vmem:[#allocation1 + $0x1] ss:$4 sm:$0xff] %v92_v24  ;;  %v2768_v43 = vor.u32 %v3524_v28, %v2767_v27  ;;  %1405 = vmatpush.bf16.msra.mxu2 %v2640_v40  ;;  %v2625_v20 = vld [vmem:[#allocation6 + $0x1f0] sm:$0xf0] }
  0x38   :  { %v3007_v32 = vld [vmem:[#allocation6 + $0x4e0] sm:$0xf]  ;;  %v3584_v33 = vld [vmem:[#allocation6 + $0x4ec] sm:$0xf0]  ;;  %126 = vst [vmem:[#allocation1 + $0x2] ss:$4 sm:$0xff] %v94_v29 }
  0x39   :  { %v3135_v34 = vld [vmem:[#allocation6 + $0x5e0] sm:$0xf]  ;;  %v3616_v35 = vld [vmem:[#allocation6 + $0x5ec] sm:$0xf0]  ;;  %128 = vst [vmem:[#allocation1 + $0x3] ss:$4 sm:$0xff] %v96_v30  ;;  %v3008_v44 = vor.u32 %v3584_v33, %v3007_v32  ;;  %1419 = vmatpush.bf16.msra.mxu3 %v2768_v43  ;;  %v2628_v30 = vor.u32 %v3486_v19, %v2625_v20 }
  0x3a   :  { %v3151_v41 = vld [vmem:[#allocation6 + $0x600] sm:$0xf]  ;;  %v3620_v42 = vld [vmem:[#allocation6 + $0x60c] sm:$0xf0]  ;;  %v3136_v45 = vor.u32 %v3616_v35, %v3135_v34  ;;  %v3482_v24 = vld [vmem:[#allocation6 + $0x1c4] sm:$0xf] }
  0x3b   :  { %v2991_v47 = vld [vmem:[#allocation6 + $0x4c0] sm:$0xf]  ;;  %v3580_v48 = vld [vmem:[#allocation6 + $0x4cc] sm:$0xf0]  ;;  %v3152_v51 = vor.u32 %v3620_v42, %v3151_v41  ;;  %1426 = vmatpush.bf16.msrb.mxu0 %v3008_v44  ;;  %v2609_v25 = vld [vmem:[#allocation6 + $0x1d0] sm:$0xf0] }
  0x3c   :  { %v3119_v49 = vld [vmem:[#allocation6 + $0x5c0] sm:$0xf]  ;;  %v3612_v52 = vld [vmem:[#allocation6 + $0x5cc] sm:$0xf0]  ;;  %v2992_v59 = vor.u32 %v3580_v48, %v2991_v47  ;;  %1440 = vmatpush.bf16.msrb.mxu1 %v3136_v45  ;;  %v3438_v27 = vld [vmem:[#allocation6 + $0x64] sm:$0xf] }
  0x3d   :  { %v2975_v56 = vld [vmem:[#allocation6 + $0x4a0] sm:$0xf]  ;;  %v3576_v57 = vld [vmem:[#allocation6 + $0x4ac] sm:$0xf0]  ;;  %1468 = vmatpush.bf16.msrb.mxu3 %v2500_v46  ;;  %v3120_v2 = vor.u32 %v3612_v52, %v3119_v49  ;;  %1461 = vmatpush.bf16.msrb.mxu2 %v3152_v51  ;;  %v2433_v28 = vld [vmem:[#allocation6 + $0x70] sm:$0xf0] }
  0x3e   :  { %v3103_v60 = vld [vmem:[#allocation6 + $0x5a0] sm:$0xf]  ;;  %v3608_v61 = vld [vmem:[#allocation6 + $0x5ac] sm:$0xf0]  ;;  %v2976_v7 = vor.u32 %v3576_v57, %v2975_v56  ;;  %v2436_v42 = vor.u32 %v3438_v27, %v2433_v28  ;;  %v91_v45 = vld [vmem:[#allocation3 + $0x8] sm:$0x3f] }
  0x3f   :  { %v104_v6 = vld [vmem:[#allocation3 + $0x62] sm:$0xff]  ;;  %1427 = vmatpush.bf16.msrb.mxu0 %v2992_v59  ;;  %v2959_v8 = vld [vmem:[#allocation6 + $0x480] sm:$0xf]  ;;  %v3104_v10 = vor.u32 %v3608_v61, %v3103_v60  ;;  %v3478_v46 = vld [vmem:[#allocation6 + $0x1a4] sm:$0xf] }
  0x40   :  { %v137_v0 = vld.sshfl [vmem:[#allocation1] sm:$0xff pattern:$0x73625140]  ;;  %v138_v1 = vld.sshfl [vmem:[#allocation1 + $0x8] sm:$0xff pattern:$0x73625140]  ;;  %1441 = vmatpush.bf16.msrb.mxu1 %v3120_v2 }
  0x41   :  { %v139_v4 = vld.sshfl [vmem:[#allocation1 + $0x10] sm:$0xff pattern:$0x73625140]  ;;  %v140_v5 = vld.sshfl [vmem:[#allocation1 + $0x18] sm:$0xff pattern:$0x73625140]  ;;  %1469 = vmatpush.bf16.msrb.mxu3 %v2484_v3 }
  0x42   :  { %144 = vst [vmem:[#allocation1] ss:$4 sm:$0xff] %v98_v50  ;;  %v3572_v9 = vld [vmem:[#allocation6 + $0x48c] sm:$0xf0]  ;;  %v3087_v12 = vld [vmem:[#allocation6 + $0x580] sm:$0xf]  ;;  %v2612_v50 = vor.u32 %v3482_v24, %v2609_v25 }
  0x43   :  { %145 = vst [vmem:[#allocation1 + $0x1] ss:$4 sm:$0xff] %v100_v55  ;;  %v3604_v13 = vld [vmem:[#allocation6 + $0x58c] sm:$0xf0]  ;;  %1428 = vmatpush.bf16.msrb.mxu0 %v2976_v7  ;;  %v2960_v16 = vor.u32 %v3572_v9, %v2959_v8  ;;  %v2943_v21 = vld [vmem:[#allocation6 + $0x460] sm:$0xf] }
  0x44   :  { %146 = vst [vmem:[#allocation1 + $0x2] ss:$4 sm:$0xff] %v102_v58  ;;  %1442 = vmatpush.bf16.msrb.mxu1 %v3104_v10  ;;  %v3088_v17 = vor.u32 %v3604_v13, %v3087_v12  ;;  %v3568_v22 = vld [vmem:[#allocation6 + $0x46c] sm:$0xf0]  ;;  %v3071_v23 = vld [vmem:[#allocation6 + $0x560] sm:$0xf] }
  0x45   :  { %147 = vst [vmem:[#allocation1 + $0x3] ss:$4 sm:$0xff] %v104_v6  ;;  %1470 = vmatpush.bf16.msrb.mxu3 %v2468_v11  ;;  %v3600_v26 = vld [vmem:[#allocation6 + $0x56c] sm:$0xf0]  ;;  %v2927_v32 = vld [vmem:[#allocation6 + $0x440] sm:$0xf]  ;;  %v2944_v38 = vor.u32 %v3568_v22, %v2943_v21 }
  0x46   :  { %v3564_v33 = vld [vmem:[#allocation6 + $0x44c] sm:$0xf0]  ;;  %v3072_v41 = vor.u32 %v3600_v26, %v3071_v23  ;;  %v3055_v43 = vld [vmem:[#allocation6 + $0x540] sm:$0xf]  ;;  %v3434_v47 = vld [vmem:[#allocation6 + $0x44] sm:$0xf] }
  0x47   :  { %1429 = vmatpush.bf16.msrb.mxu0 %v2960_v16  ;;  %v3596_v44 = vld [vmem:[#allocation6 + $0x54c] sm:$0xf0]  ;;  %v2417_v48 = vld [vmem:[#allocation6 + $0x50] sm:$0xf0]  ;;  %v93_v49 = vld [vmem:[#allocation3 + $0x16] sm:$0x3f]  ;;  %v2928_v54 = vor.u32 %v3564_v33, %v2927_v32 }
  0x48   :  { %1443 = vmatpush.bf16.msrb.mxu1 %v3088_v17  ;;  %v2593_v51 = vld [vmem:[#allocation6 + $0x1b0] sm:$0xf0]  ;;  %v2911_v52 = vld [vmem:[#allocation6 + $0x420] sm:$0xf]  ;;  %v3560_v55 = vld [vmem:[#allocation6 + $0x42c] sm:$0xf0]  ;;  %v3056_v57 = vor.u32 %v3596_v44, %v3055_v43  ;;  %v2420_v58 = vor.u32 %v3434_v47, %v2417_v48 }
  0x49   :  { %1471 = vmatpush.bf16.msrb.mxu3 %v2452_v18  ;;  %v97_v56 = vld [vmem:[#allocation3 + $0x32] sm:$0x3f]  ;;  %130 = vst [vmem:[#allocation1 + $0x20] ss:$4 sm:$0xff] %v91_v45  ;;  %v3592_v60 = vld [vmem:[#allocation6 + $0x52c] sm:$0xf0]  ;;  %v2596_v63 = vor.u32 %v3478_v46, %v2593_v51  ;;  %v2912_v2 = vor.u32 %v3560_v55, %v2911_v52 }
  0x4a   :  { %v3039_v59 = vld [vmem:[#allocation6 + $0x520] sm:$0xf]  ;;  %132 = vst [vmem:[#allocation1 + $0x21] ss:$4 sm:$0xff] %v93_v49  ;;  %v3430_v61 = vld [vmem:[#allocation6 + $0x24] sm:$0xf] }
  0x4b   :  { %1430 = vmatpush.bf16.msrb.mxu0 %v2944_v38  ;;  %136 = vst [vmem:[#allocation1 + $0x23] ss:$4 sm:$0xff] %v97_v56  ;;  %v2895_v3 = vld [vmem:[#allocation6 + $0x400] sm:$0xf]  ;;  %v3556_v6 = vld [vmem:[#allocation6 + $0x40c] sm:$0xf0] }
  0x4c   :  { %v154_v29 = vld.sshfl [vmem:[#allocation1 + $0x10] sm:$0xff pattern:$0x73625140]  ;;  %v152_v31 = vld.sshfl [vmem:[#allocation1] sm:$0xff pattern:$0x73625140]  ;;  %1444 = vmatpush.bf16.msrb.mxu1 %v3072_v41  ;;  %v2896_v20 = vor.u32 %v3556_v6, %v2895_v3 }
  0x4d   :  { %v3892_v34 = vpack.c.bf16 %v154_v29, %v139_v4  ;;  %v3894_v35 = vpack.c.bf16 %v152_v31, %v137_v0  ;;  %v155_v36 = vld.sshfl [vmem:[#allocation1 + $0x18] sm:$0xff pattern:$0x73625140]  ;;  %v153_v37 = vld.sshfl [vmem:[#allocation1 + $0x8] sm:$0xff pattern:$0x73625140]  ;;  %1472 = vmatpush.bf16.msrb.mxu3 %v2436_v42  ;;  %v3040_v4 = vor.u32 %v3592_v60, %v3039_v59 }
  0x4e   :  { %v3896_v39 = vpack.c.bf16 %v155_v36, %v140_v5  ;;  %v3898_v40 = vpack.c.bf16 %v153_v37, %v138_v1  ;;  %v3474_v0 = vld [vmem:[#allocation6 + $0x184] sm:$0xf]  ;;  %v2577_v1 = vld [vmem:[#allocation6 + $0x190] sm:$0xf0]  ;;  %v2404_v5 = vor.u32 %v3430_v61, %v2401_v62  ;;  %v3023_v7 = vld [vmem:[#allocation6 + $0x500] sm:$0xf] }
  0x4f   :  { %1406 = vmatmul.bf16.vlgmr.msra.gmra.mxu2 %v3892_v34  ;;  %1378 = vmatmul.bf16.vlgmr.msra.gmra.mxu0 %v3894_v35  ;;  %v3588_v8 = vld [vmem:[#allocation6 + $0x50c] sm:$0xf0]  ;;  %v3470_v9 = vld [vmem:[#allocation6 + $0x164] sm:$0xf]  ;;  %v2561_v10 = vld [vmem:[#allocation6 + $0x170] sm:$0xf0]  ;;  %v2580_v14 = vor.u32 %v3474_v0, %v2577_v1 }
  0x50   :  { %1482 = vmatpush.bf16.msra.mxu2 %v2628_v30  ;;  %1420 = vmatmul.bf16.vlgmr.msra.gmra.mxu3 %v3896_v39  ;;  %v3426_v11 = vld [vmem:[#allocation6 + $0x4] sm:$0xf]  ;;  %v2385_v12 = vld [vmem:[#allocation6 + $0x10] sm:$0xf0]  ;;  %v101_v19 = vld [vmem:[#allocation3 + $0x4e] sm:$0x3f]  ;;  %v3024_v24 = vor.u32 %v3588_v8, %v3023_v7  ;;  %v2564_v38 = vor.u32 %v3470_v9, %v2561_v10 }
  0x51   :  { %1392 = vmatmul.bf16.vlgmr.msra.gmra.mxu1 %v3898_v40  ;;  %1431 = vmatpush.bf16.msrb.mxu0 %v2928_v54  ;;  %v3518_v13 = vld [vmem:[#allocation6 + $0x2e4] sm:$0xf]  ;;  %v99_v15 = vld [vmem:[#allocation3 + $0x40] sm:$0x3f]  ;;  %v2388_v25 = vor.u32 %v3426_v11, %v2385_v12  ;;  %v105_v31 = vld [vmem:[#allocation3 + $0x6a] sm:$0x3f] }
  0x52   :  { %1445 = vmatpush.bf16.msrb.mxu1 %v3056_v57  ;;  %1473 = vmatpush.bf16.msrb.mxu3 %v2420_v58  ;;  %v2753_v16 = vld [vmem:[#allocation6 + $0x2f0] sm:$0xf0]  ;;  %v3550_v17 = vld [vmem:[#allocation6 + $0x3e4] sm:$0xf]  ;;  %v103_v23 = vld [vmem:[#allocation3 + $0x5c] sm:$0x3f] }
  0x53   :  { %v2881_v18 = vld [vmem:[#allocation6 + $0x3f0] sm:$0xf0]  ;;  %v3582_v21 = vld [vmem:[#allocation6 + $0x4e4] sm:$0xf]  ;;  %v2756_v36 = vor.u32 %v3518_v13, %v2753_v16 }
  0x54   :  { %1483 = vmatpush.bf16.msra.mxu2 %v2612_v50  ;;  %v3009_v22 = vld [vmem:[#allocation6 + $0x4f0] sm:$0xf0]  ;;  %v3514_v26 = vld [vmem:[#allocation6 + $0x2c4] sm:$0xf]  ;;  %v2884_v37 = vor.u32 %v3550_v17, %v2881_v18 }
  0x55   :  { %1432 = vmatpush.bf16.msrb.mxu0 %v2912_v2  ;;  %v2737_v27 = vld [vmem:[#allocation6 + $0x2d0] sm:$0xf0]  ;;  %v3546_v28 = vld [vmem:[#allocation6 + $0x3c4] sm:$0xf]  ;;  %v3012_v42 = vor.u32 %v3582_v21, %v3009_v22 }
  0x56   :  { %1446 = vmatpush.bf16.msrb.mxu1 %v3040_v4  ;;  %1474 = vmatpush.bf16.msrb.mxu3 %v2404_v5  ;;  %v3466_v29 = vld [vmem:[#allocation6 + $0x144] sm:$0xf]  ;;  %v2545_v30 = vld [vmem:[#allocation6 + $0x150] sm:$0xf0]  ;;  %v2740_v47 = vor.u32 %v3514_v26, %v2737_v27 }
  0x57   :  { %v3904_v32 = vld.sshfl [vmem:[#allocation1 + $0x20] sm:$0xff pattern:$0x73625140]  ;;  %v3906_v33 = vld.sshfl [vmem:[#allocation1 + $0x28] sm:$0xff pattern:$0x73625140]  ;;  %v2548_v51 = vor.u32 %v3466_v29, %v2545_v30 }
  0x58   :  { %1484 = vmatpush.bf16.msra.mxu2 %v2596_v63  ;;  %v143_v41 = vld.sshfl [vmem:[#allocation1 + $0x30] sm:$0xff pattern:$0x73625140]  ;;  %v2865_v43 = vld [vmem:[#allocation6 + $0x3d0] sm:$0xf0] }
  0x59   :  { %148 = vst [vmem:[#allocation1 + $0x20] ss:$4 sm:$0xff] %v99_v15  ;;  %1433 = vmatpush.bf16.msrb.mxu0 %v2896_v20  ;;  %v3578_v44 = vld [vmem:[#allocation6 + $0x4c4] sm:$0xf]  ;;  %v2993_v45 = vld [vmem:[#allocation6 + $0x4d0] sm:$0xf0]  ;;  %v2868_v48 = vor.u32 %v3546_v28, %v2865_v43 }
  0x5a   :  { %149 = vst [vmem:[#allocation1 + $0x21] ss:$4 sm:$0xff] %v101_v19  ;;  %1447 = vmatpush.bf16.msrb.mxu1 %v3024_v24  ;;  %1475 = vmatpush.bf16.msrb.mxu3 %v2388_v25  ;;  %v3462_v46 = vld [vmem:[#allocation6 + $0x124] sm:$0xf]  ;;  %v2721_v50 = vld [vmem:[#allocation6 + $0x2b0] sm:$0xf0]  ;;  %v2996_v52 = vor.u32 %v3578_v44, %v2993_v45 }
  0x5b   :  { %150 = vst [vmem:[#allocation1 + $0x22] ss:$4 sm:$0xff] %v103_v23  ;;  %v3510_v49 = vld [vmem:[#allocation6 + $0x2a4] sm:$0xf]  ;;  %v2849_v54 = vld [vmem:[#allocation6 + $0x3b0] sm:$0xf0] }
  0x5c   :  { %1485 = vmatpush.bf16.msra.mxu2 %v2580_v14  ;;  %151 = vst [vmem:[#allocation1 + $0x23] ss:$4 sm:$0xff] %v105_v31  ;;  %v3542_v53 = vld [vmem:[#allocation6 + $0x3a4] sm:$0xf]  ;;  %v2529_v55 = vld [vmem:[#allocation6 + $0x130] sm:$0xf0]  ;;  %v2724_v60 = vor.u32 %v3510_v49, %v2721_v50 }
  0x5d   :  { %1496 = vmatpush.bf16.msra.mxu0 %v2756_v36  ;;  %v3574_v56 = vld [vmem:[#allocation6 + $0x4a4] sm:$0xf]  ;;  %v2977_v57 = vld [vmem:[#allocation6 + $0x4b0] sm:$0xf0]  ;;  %v2852_v61 = vor.u32 %v3542_v53, %v2849_v54  ;;  %v2532_v62 = vor.u32 %v3462_v46, %v2529_v55 }
  0x5e   :  { %1510 = vmatpush.bf16.msra.mxu1 %v2884_v37  ;;  %1524 = vmatpush.bf16.msra.mxu3 %v3012_v42  ;;  %v3458_v58 = vld [vmem:[#allocation6 + $0x104] sm:$0xf]  ;;  %v2513_v59 = vld [vmem:[#allocation6 + $0x110] sm:$0xf0]  ;;  %v2980_v0 = vor.u32 %v3574_v56, %v2977_v57 }
  0x5f   :  { %v3614_v63 = vld [vmem:[#allocation6 + $0x5e4] sm:$0xf]  ;;  %v2705_v2 = vld [vmem:[#allocation6 + $0x290] sm:$0xf0]  ;;  %v2516_v11 = vor.u32 %v3458_v58, %v2513_v59 }
  0x60   :  { %1486 = vmatpush.bf16.msra.mxu2 %v2564_v38  ;;  %1476 = vmatmul.bf16.vlgmr.msrb.gmra.mxu3 %v3894_v35  ;;  %v3506_v1 = vld [vmem:[#allocation6 + $0x284] sm:$0xf]  ;;  %v3137_v3 = vld [vmem:[#allocation6 + $0x5f0] sm:$0xf0] }
  0x61   :  { %1497 = vmatpush.bf16.msra.mxu0 %v2740_v47  ;;  %v3538_v4 = vld [vmem:[#allocation6 + $0x384] sm:$0xf]  ;;  %v2833_v5 = vld [vmem:[#allocation6 + $0x390] sm:$0xf0]  ;;  %v2708_v12 = vor.u32 %v3506_v1, %v2705_v2  ;;  %v3140_v18 = vor.u32 %v3614_v63, %v3137_v3 }
  0x62   :  { %1511 = vmatpush.bf16.msra.mxu1 %v2868_v48  ;;  %1525 = vmatpush.bf16.msra.mxu3 %v2996_v52  ;;  %v3570_v6 = vld [vmem:[#allocation6 + $0x484] sm:$0xf]  ;;  %v2961_v7 = vld [vmem:[#allocation6 + $0x490] sm:$0xf0]  ;;  %v2836_v16 = vor.u32 %v3538_v4, %v2833_v5  ;;  %v2503_v5 = vld [vmem:[#allocation6 + $0xe8] sm:$0xf] }
  0x63   :  { %v3502_v8 = vld [vmem:[#allocation6 + $0x264] sm:$0xf]  ;;  %v158_v9 = vld.sshfl [vmem:[#allocation1 + $0x30] sm:$0xff pattern:$0x73625140]  ;;  %v2964_v21 = vor.u32 %v3570_v6, %v2961_v7 }
  0x64   :  { %1487 = vmatpush.bf16.msra.mxu2 %v2548_v51  ;;  %v156_v10 = vld.sshfl [vmem:[#allocation1 + $0x20] sm:$0xff pattern:$0x73625140]  ;;  %v3909_v13 = vpack.c.bf16 %v158_v9, %v143_v41  ;;  %v157_v15 = vld.sshfl [vmem:[#allocation1 + $0x28] sm:$0xff pattern:$0x73625140] }
  0x65   :  { %1498 = vmatpush.bf16.msra.mxu0 %v2724_v60  ;;  %v3912_v14 = vpack.c.bf16 %v156_v10, %v3904_v32  ;;  %v2689_v17 = vld [vmem:[#allocation6 + $0x270] sm:$0xf0]  ;;  %v3915_v19 = vpack.c.bf16 %v157_v15, %v3906_v33  ;;  %v3610_v20 = vld [vmem:[#allocation6 + $0x5c4] sm:$0xf]  ;;  %v3457_v7 = vld [vmem:[#allocation6 + $0xf4] sm:$0xf0] }
  0x66   :  { %1512 = vmatpush.bf16.msra.mxu1 %v2852_v61  ;;  %1526 = vmatpush.bf16.msra.mxu3 %v2980_v0  ;;  %v3534_v22 = vld [vmem:[#allocation6 + $0x364] sm:$0xf]  ;;  %v2817_v23 = vld [vmem:[#allocation6 + $0x370] sm:$0xf0]  ;;  %v2692_v27 = vor.u32 %v3502_v8, %v2689_v17  ;;  %v2631_v8 = vld [vmem:[#allocation6 + $0x1e8] sm:$0xf] }
  0x67   :  { %3165 = vmatmul.msk.bf16.vlgmr.msrb.gmra.mxu2 %vm1366_vm0, %v3909_v13  ;;  %1434 = vmatmul.bf16.vlgmr.msrb.gmra.mxu0 %v3912_v14  ;;  %v3121_v24 = vld [vmem:[#allocation6 + $0x5d0] sm:$0xf0]  ;;  %v3566_v25 = vld [vmem:[#allocation6 + $0x464] sm:$0xf]  ;;  %v2820_v28 = vor.u32 %v3534_v22, %v2817_v23  ;;  %v3489_v9 = vld [vmem:[#allocation6 + $0x1f4] sm:$0xf0] }
  0x68   :  { %1488 = vmatpush.bf16.msra.mxu2 %v2532_v62  ;;  %v2945_v26 = vld [vmem:[#allocation6 + $0x470] sm:$0xf0]  ;;  %1448 = vmatmul.bf16.vlgmr.msrb.gmra.mxu1 %v3915_v19  ;;  %v3498_v29 = vld [vmem:[#allocation6 + $0x244] sm:$0xf]  ;;  %v3124_v31 = vor.u32 %v3610_v20, %v3121_v24  ;;  %v3521_v17 = vld [vmem:[#allocation6 + $0x2f4] sm:$0xf0]  ;;  %v2632_v22 = vor.u32 %v3489_v9, %v2631_v8 }
  0x69   :  { %1499 = vmatpush.bf16.msra.mxu0 %v2708_v12  ;;  %v2673_v30 = vld [vmem:[#allocation6 + $0x250] sm:$0xf0]  ;;  %v3606_v32 = vld [vmem:[#allocation6 + $0x5a4] sm:$0xf]  ;;  %v2948_v33 = vor.u32 %v3566_v25, %v2945_v26  ;;  %v2487_v23 = vld [vmem:[#allocation6 + $0xc8] sm:$0xf] }
  0x6a   :  { %1513 = vmatpush.bf16.msra.mxu1 %v2836_v16  ;;  %1527 = vmatpush.bf16.msra.mxu3 %v2964_v21  ;;  %v3530_v36 = vld [vmem:[#allocation6 + $0x344] sm:$0xf]  ;;  %v2801_v37 = vld [vmem:[#allocation6 + $0x350] sm:$0xf0]  ;;  %v2676_v43 = vor.u32 %v3498_v29, %v2673_v30  ;;  %v2759_v16 = vld [vmem:[#allocation6 + $0x2e8] sm:$0xf]  ;;  %v2504_v21 = vor.u32 %v3457_v7, %v2503_v5 }
  0x6b   :  { %v3105_v38 = vld [vmem:[#allocation6 + $0x5b0] sm:$0xf0]  ;;  %v3562_v41 = vld [vmem:[#allocation6 + $0x444] sm:$0xf]  ;;  %v2804_v44 = vor.u32 %v3530_v36, %v2801_v37  ;;  %v3453_v24 = vld [vmem:[#allocation6 + $0xd4] sm:$0xf0] }
  0x6c   :  { %1489 = vmatpush.bf16.msra.mxu2 %v2516_v11  ;;  %v2929_v42 = vld [vmem:[#allocation6 + $0x450] sm:$0xf0]  ;;  %v3494_v45 = vld [vmem:[#allocation6 + $0x224] sm:$0xf]  ;;  %v3108_v47 = vor.u32 %v3606_v32, %v3105_v38  ;;  %v2615_v25 = vld [vmem:[#allocation6 + $0x1c8] sm:$0xf] }
  0x6d   :  { %1500 = vmatpush.bf16.msra.mxu0 %v2692_v27  ;;  %v2657_v46 = vld [vmem:[#allocation6 + $0x230] sm:$0xf0]  ;;  %v3602_v48 = vld [vmem:[#allocation6 + $0x584] sm:$0xf]  ;;  %v2932_v49 = vor.u32 %v3562_v41, %v2929_v42  ;;  %v3485_v26 = vld [vmem:[#allocation6 + $0x1d4] sm:$0xf0]  ;;  %v2760_v27 = vor.u32 %v3521_v17, %v2759_v16 }
  0x6e   :  { %1514 = vmatpush.bf16.msra.mxu1 %v2820_v28  ;;  %1528 = vmatpush.bf16.msra.mxu3 %v2948_v33  ;;  %v3526_v50 = vld [vmem:[#allocation6 + $0x324] sm:$0xf]  ;;  %v2785_v51 = vld [vmem:[#allocation6 + $0x330] sm:$0xf0]  ;;  %v2660_v55 = vor.u32 %v3494_v45, %v2657_v46  ;;  %v2743_v29 = vld [vmem:[#allocation6 + $0x2c8] sm:$0xf]  ;;  %v2488_v33 = vor.u32 %v3453_v24, %v2487_v23  ;;  %v2616_v36 = vor.u32 %v3485_v26, %v2615_v25 }
  0x6f   :  { %v3089_v52 = vld [vmem:[#allocation6 + $0x590] sm:$0xf0]  ;;  %v3558_v53 = vld [vmem:[#allocation6 + $0x424] sm:$0xf]  ;;  %v2788_v58 = vor.u32 %v3526_v50, %v2785_v51  ;;  %v3517_v30 = vld [vmem:[#allocation6 + $0x2d4] sm:$0xf0] }
  0x70   :  { %1538 = vmatpush.bf16.msrb.mxu2 %v3140_v18  ;;  %v2913_v54 = vld [vmem:[#allocation6 + $0x430] sm:$0xf0]  ;;  %v3598_v56 = vld [vmem:[#allocation6 + $0x564] sm:$0xf]  ;;  %v3092_v62 = vor.u32 %v3602_v48, %v3089_v52  ;;  %v2471_v37 = vld [vmem:[#allocation6 + $0xa8] sm:$0xf] }
  0x71   :  { %1501 = vmatpush.bf16.msra.mxu0 %v2676_v43  ;;  %v3073_v57 = vld [vmem:[#allocation6 + $0x570] sm:$0xf0]  ;;  %v3490_v59 = vld [vmem:[#allocation6 + $0x204] sm:$0xf]  ;;  %v2916_v63 = vor.u32 %v3558_v53, %v2913_v54  ;;  %v3449_v38 = vld [vmem:[#allocation6 + $0xb4] sm:$0xf0]  ;;  %v2744_v43 = vor.u32 %v3517_v30, %v2743_v29 }
  0x72   :  { %1515 = vmatpush.bf16.msra.mxu1 %v2804_v44  ;;  %v2641_v60 = vld [vmem:[#allocation6 + $0x210] sm:$0xf0]  ;;  %v3522_v61 = vld [vmem:[#allocation6 + $0x304] sm:$0xf]  ;;  %1529 = vmatpush.bf16.msra.mxu3 %v2932_v49  ;;  %v3076_v12 = vor.u32 %v3598_v56, %v3073_v57  ;;  %v2599_v41 = vld [vmem:[#allocation6 + $0x1a8] sm:$0xf]  ;;  %v2472_v50 = vor.u32 %v3449_v38, %v2471_v37 }
  0x73   :  { %v2769_v0 = vld [vmem:[#allocation6 + $0x310] sm:$0xf0]  ;;  %v3618_v1 = vld [vmem:[#allocation6 + $0x604] sm:$0xf]  ;;  %v2644_v6 = vor.u32 %v3490_v59, %v2641_v60  ;;  %v3481_v42 = vld [vmem:[#allocation6 + $0x1b4] sm:$0xf0] }
  0x74   :  { %1539 = vmatpush.bf16.msrb.mxu2 %v3124_v31  ;;  %v3153_v2 = vld [vmem:[#allocation6 + $0x610] sm:$0xf0]  ;;  %v3554_v3 = vld [vmem:[#allocation6 + $0x404] sm:$0xf]  ;;  %v2772_v10 = vor.u32 %v3522_v61, %v2769_v0  ;;  %v2727_v45 = vld [vmem:[#allocation6 + $0x2a8] sm:$0xf]  ;;  %v2600_v51 = vor.u32 %v3481_v42, %v2599_v41 }
  0x75   :  { %v2897_v4 = vld [vmem:[#allocation6 + $0x410] sm:$0xf0]  ;;  %1502 = vmatpush.bf16.msra.mxu0 %v2660_v55  ;;  %v3156_v11 = vor.u32 %v3618_v1, %v3153_v2  ;;  %v3594_v18 = vld [vmem:[#allocation6 + $0x544] sm:$0xf]  ;;  %v3513_v46 = vld [vmem:[#allocation6 + $0x2b4] sm:$0xf0] }
  0x76   :  { %1516 = vmatpush.bf16.msra.mxu1 %v2788_v58  ;;  %1530 = vmatpush.bf16.msra.mxu3 %v2916_v63  ;;  %v2900_v15 = vor.u32 %v3554_v3, %v2897_v4  ;;  %v3057_v20 = vld [vmem:[#allocation6 + $0x550] sm:$0xf0]  ;;  %v3590_v31 = vld [vmem:[#allocation6 + $0x524] sm:$0xf]  ;;  %v2887_v49 = vld [vmem:[#allocation6 + $0x3e8] sm:$0xf]  ;;  %v2728_v55 = vor.u32 %v3513_v46, %v2727_v45 }
  0x77   :  { %1490 = vmatmul.bf16.vlgmr.msra.gmra.mxu2 %v3898_v40  ;;  %v3060_v28 = vor.u32 %v3594_v18, %v3057_v20  ;;  %v3041_v32 = vld [vmem:[#allocation6 + $0x530] sm:$0xf0]  ;;  %v3553_v52 = vld [vmem:[#allocation6 + $0x3f4] sm:$0xf0]  ;;  %v2455_v53 = vld [vmem:[#allocation6 + $0x88] sm:$0xf] }
  0x78   :  { %1540 = vmatpush.bf16.msrb.mxu2 %v3108_v47  ;;  %v3044_v44 = vor.u32 %v3590_v31, %v3041_v32  ;;  %v3586_v47 = vld [vmem:[#allocation6 + $0x504] sm:$0xf]  ;;  %v3025_v48 = vld [vmem:[#allocation6 + $0x510] sm:$0xf0]  ;;  %v3445_v54 = vld [vmem:[#allocation6 + $0x94] sm:$0xf0]  ;;  %v2888_v61 = vor.u32 %v3553_v52, %v2887_v49 }
  0x79   :  { %1503 = vmatpush.bf16.msra.mxu0 %v2644_v6  ;;  %v2583_v56 = vld [vmem:[#allocation6 + $0x188] sm:$0xf]  ;;  %v3477_v57 = vld [vmem:[#allocation6 + $0x194] sm:$0xf0]  ;;  %v3028_v58 = vor.u32 %v3586_v47, %v3025_v48  ;;  %v2456_v63 = vor.u32 %v3445_v54, %v2455_v53 }
  0x7a   :  { %1517 = vmatpush.bf16.msra.mxu1 %v2772_v10  ;;  %1531 = vmatpush.bf16.msra.mxu3 %v2900_v15  ;;  %v2711_v59 = vld [vmem:[#allocation6 + $0x288] sm:$0xf]  ;;  %v3509_v60 = vld [vmem:[#allocation6 + $0x294] sm:$0xf0]  ;;  %v2584_v1 = vor.u32 %v3477_v57, %v2583_v56 }
  0x7b   :  { %v3549_v0 = vld [vmem:[#allocation6 + $0x3d4] sm:$0xf0]  ;;  %v2439_v2 = vld [vmem:[#allocation6 + $0x68] sm:$0xf]  ;;  %v2712_v4 = vor.u32 %v3509_v60, %v2711_v59 }
  0x7c   :  { %1541 = vmatpush.bf16.msrb.mxu2 %v3092_v62  ;;  %1504 = vmatmul.bf16.vlgmr.msra.gmra.mxu0 %v3892_v34  ;;  %v2871_v62 = vld [vmem:[#allocation6 + $0x3c8] sm:$0xf]  ;;  %v3441_v3 = vld [vmem:[#allocation6 + $0x74] sm:$0xf0] }
  0x7d   :  { %1559 = vmatpush.bf16.msrb.mxu0 %v3156_v11  ;;  %1518 = vmatmul.bf16.vlgmr.msra.gmra.mxu1 %v3896_v39  ;;  %v2567_v5 = vld [vmem:[#allocation6 + $0x168] sm:$0xf]  ;;  %v3473_v6 = vld [vmem:[#allocation6 + $0x174] sm:$0xf0]  ;;  %v2872_v9 = vor.u32 %v3549_v0, %v2871_v62  ;;  %v2440_v11 = vor.u32 %v3441_v3, %v2439_v2 }
  0x7e   :  { %1566 = vmatpush.bf16.msrb.mxu1 %v2504_v21  ;;  %1580 = vmatpush.bf16.msrb.mxu3 %v2632_v22  ;;  %v2695_v7 = vld [vmem:[#allocation6 + $0x268] sm:$0xf]  ;;  %v3505_v8 = vld [vmem:[#allocation6 + $0x274] sm:$0xf0]  ;;  %v2568_v15 = vor.u32 %v3473_v6, %v2567_v5 }
  0x7f   :  { %1532 = vmatmul.bf16.vlgmr.msra.gmra.mxu3 %v3912_v14  ;;  %v2855_v10 = vld [vmem:[#allocation6 + $0x3a8] sm:$0xf]  ;;  %v3437_v17 = vld [vmem:[#allocation6 + $0x54] sm:$0xf0]  ;;  %v2696_v18 = vor.u32 %v3505_v8, %v2695_v7  ;;  %v3487_v7 = vld [vmem:[#allocation6 + $0x1ec] sm:$0xf] }
  0x80   :  { %1542 = vmatpush.bf16.msrb.mxu2 %v3076_v12  ;;  %v3545_v12 = vld [vmem:[#allocation6 + $0x3b4] sm:$0xf0]  ;;  %v2423_v16 = vld [vmem:[#allocation6 + $0x48] sm:$0xf]  ;;  %v2633_v8 = vld [vmem:[#allocation6 + $0x1f8] sm:$0xf0] }
  0x81   :  { %1594 = vmatpush.bf16.msra.mxu0 %v2760_v27  ;;  %v2551_v20 = vld [vmem:[#allocation6 + $0x148] sm:$0xf]  ;;  %v3469_v21 = vld [vmem:[#allocation6 + $0x154] sm:$0xf0]  ;;  %v2856_v24 = vor.u32 %v3545_v12, %v2855_v10  ;;  %v2424_v26 = vor.u32 %v3437_v17, %v2423_v16  ;;  %v2636_v16 = vor.u32 %v3487_v7, %v2633_v8 }
  0x82   :  { %1567 = vmatpush.bf16.msrb.mxu1 %v2488_v33  ;;  %1581 = vmatpush.bf16.msrb.mxu3 %v2616_v36  ;;  %v2679_v22 = vld [vmem:[#allocation6 + $0x248] sm:$0xf]  ;;  %v3501_v23 = vld [vmem:[#allocation6 + $0x254] sm:$0xf0] }
  0x83   :  { %v2839_v25 = vld [vmem:[#allocation6 + $0x388] sm:$0xf]  ;;  %v3541_v27 = vld [vmem:[#allocation6 + $0x394] sm:$0xf0]  ;;  %v2680_v31 = vor.u32 %v3501_v23, %v2679_v22  ;;  %v3483_v22 = vld [vmem:[#allocation6 + $0x1cc] sm:$0xf] }
  0x84   :  { %1543 = vmatpush.bf16.msrb.mxu2 %v3060_v28  ;;  %v2552_v28 = vor.u32 %v3469_v21, %v2551_v20  ;;  %v2407_v29 = vld [vmem:[#allocation6 + $0x28] sm:$0xf]  ;;  %v3433_v30 = vld [vmem:[#allocation6 + $0x34] sm:$0xf0]  ;;  %v2840_v38 = vor.u32 %v3541_v27, %v2839_v25  ;;  %v2617_v23 = vld [vmem:[#allocation6 + $0x1d8] sm:$0xf0] }
  0x85   :  { %1595 = vmatpush.bf16.msra.mxu0 %v2744_v43  ;;  %v2535_v32 = vld [vmem:[#allocation6 + $0x128] sm:$0xf]  ;;  %v3465_v33 = vld [vmem:[#allocation6 + $0x134] sm:$0xf0]  ;;  %v2408_v43 = vor.u32 %v3433_v30, %v2407_v29  ;;  %v3455_v27 = vld [vmem:[#allocation6 + $0xec] sm:$0xf] }
  0x86   :  { %1568 = vmatpush.bf16.msrb.mxu1 %v2472_v50  ;;  %1582 = vmatpush.bf16.msrb.mxu3 %v2600_v51  ;;  %v2663_v36 = vld [vmem:[#allocation6 + $0x228] sm:$0xf]  ;;  %v3497_v37 = vld [vmem:[#allocation6 + $0x234] sm:$0xf0]  ;;  %v2536_v45 = vor.u32 %v3465_v33, %v2535_v32 }
  0x87   :  { %v2823_v41 = vld [vmem:[#allocation6 + $0x368] sm:$0xf]  ;;  %v3537_v42 = vld [vmem:[#allocation6 + $0x374] sm:$0xf0]  ;;  %v2664_v49 = vor.u32 %v3497_v37, %v2663_v36 }
  0x88   :  { %1544 = vmatpush.bf16.msrb.mxu2 %v3044_v44  ;;  %v2391_v44 = vld [vmem:[#allocation6 + $0x8] sm:$0xf]  ;;  %v3429_v46 = vld [vmem:[#allocation6 + $0x14] sm:$0xf0]  ;;  %v2824_v56 = vor.u32 %v3537_v42, %v2823_v41  ;;  %v2601_v41 = vld [vmem:[#allocation6 + $0x1b8] sm:$0xf0] }
  0x89   :  { %1596 = vmatpush.bf16.msra.mxu0 %v2728_v55  ;;  %v2519_v47 = vld [vmem:[#allocation6 + $0x108] sm:$0xf]  ;;  %v3461_v48 = vld [vmem:[#allocation6 + $0x114] sm:$0xf0]  ;;  %v2392_v57 = vor.u32 %v3429_v46, %v2391_v44  ;;  %v3451_v44 = vld [vmem:[#allocation6 + $0xcc] sm:$0xf] }
  0x8a   :  { %1569 = vmatpush.bf16.msrb.mxu1 %v2456_v63  ;;  %1583 = vmatpush.bf16.msrb.mxu3 %v2584_v1  ;;  %v3015_v50 = vld [vmem:[#allocation6 + $0x4e8] sm:$0xf]  ;;  %v3585_v51 = vld [vmem:[#allocation6 + $0x4f4] sm:$0xf0]  ;;  %v2520_v62 = vor.u32 %v3461_v48, %v2519_v47 }
  0x8b   :  { %v3143_v52 = vld [vmem:[#allocation6 + $0x5e8] sm:$0xf]  ;;  %v3617_v53 = vld [vmem:[#allocation6 + $0x5f4] sm:$0xf0]  ;;  %v3016_v63 = vor.u32 %v3585_v51, %v3015_v50 }
  0x8c   :  { %1545 = vmatpush.bf16.msrb.mxu2 %v3028_v58  ;;  %3166 = vmatmul.msk.bf16.vlgmr.msrb.gmra.mxu0 %vm1366_vm0, %v3909_v13  ;;  %v2647_v54 = vld [vmem:[#allocation6 + $0x208] sm:$0xf]  ;;  %v3493_v55 = vld [vmem:[#allocation6 + $0x214] sm:$0xf0]  ;;  %v3144_v0 = vor.u32 %v3617_v53, %v3143_v52  ;;  %v3475_v53 = vld [vmem:[#allocation6 + $0x18c] sm:$0xf] }
  0x8d   :  { %1597 = vmatpush.bf16.msra.mxu0 %v2712_v4  ;;  %v3159_v58 = vld [vmem:[#allocation6 + $0x608] sm:$0xf]  ;;  %v3621_v59 = vld [vmem:[#allocation6 + $0x614] sm:$0xf0]  ;;  %v2648_v1 = vor.u32 %v3493_v55, %v2647_v54  ;;  %v2585_v54 = vld [vmem:[#allocation6 + $0x198] sm:$0xf0] }
  0x8e   :  { %1570 = vmatpush.bf16.msrb.mxu1 %v2440_v11  ;;  %1584 = vmatpush.bf16.msrb.mxu3 %v2568_v15  ;;  %v2807_v60 = vld [vmem:[#allocation6 + $0x348] sm:$0xf]  ;;  %v3581_v3 = vld [vmem:[#allocation6 + $0x4d4] sm:$0xf0]  ;;  %v3160_v6 = vor.u32 %v3621_v59, %v3159_v58 }
  0x8f   :  { %1546 = vmatmul.bf16.vlgmr.msrb.gmra.mxu2 %v3915_v19  ;;  %v2999_v2 = vld [vmem:[#allocation6 + $0x4c8] sm:$0xf]  ;;  %v3613_v5 = vld [vmem:[#allocation6 + $0x5d4] sm:$0xf0] }
  0x90   :  { %1608 = vmatpush.bf16.msra.mxu2 %v2888_v61  ;;  %v3533_v61 = vld [vmem:[#allocation6 + $0x354] sm:$0xf0]  ;;  %v3127_v4 = vld [vmem:[#allocation6 + $0x5c8] sm:$0xf]  ;;  %v3000_v12 = vor.u32 %v3581_v3, %v2999_v2  ;;  %v2569_v2 = vld [vmem:[#allocation6 + $0x178] sm:$0xf0] }
  0x91   :  { %1598 = vmatpush.bf16.msra.mxu0 %v2696_v18  ;;  %v2791_v10 = vld [vmem:[#allocation6 + $0x328] sm:$0xf]  ;;  %v3529_v11 = vld [vmem:[#allocation6 + $0x334] sm:$0xf0]  ;;  %v3128_v15 = vor.u32 %v3613_v5, %v3127_v4  ;;  %v3443_v4 = vld [vmem:[#allocation6 + $0x8c] sm:$0xf] }
  0x92   :  { %1571 = vmatpush.bf16.msrb.mxu1 %v2424_v26  ;;  %1585 = vmatpush.bf16.msrb.mxu3 %v2552_v28  ;;  %v2983_v17 = vld [vmem:[#allocation6 + $0x4a8] sm:$0xf]  ;;  %v3577_v18 = vld [vmem:[#allocation6 + $0x4b4] sm:$0xf0]  ;;  %v2505_v28 = vld [vmem:[#allocation6 + $0xf8] sm:$0xf0] }
  0x93   :  { %v3111_v20 = vld [vmem:[#allocation6 + $0x5a8] sm:$0xf]  ;;  %v3609_v21 = vld [vmem:[#allocation6 + $0x5b4] sm:$0xf0]  ;;  %v2984_v29 = vor.u32 %v3577_v18, %v2983_v17  ;;  %v2457_v5 = vld [vmem:[#allocation6 + $0x98] sm:$0xf0] }
  0x94   :  { %1609 = vmatpush.bf16.msra.mxu2 %v2872_v9  ;;  %v2808_v9 = vor.u32 %v3533_v61, %v2807_v60  ;;  %v2775_v25 = vld [vmem:[#allocation6 + $0x308] sm:$0xf]  ;;  %v3525_v26 = vld [vmem:[#allocation6 + $0x314] sm:$0xf0]  ;;  %v3112_v30 = vor.u32 %v3609_v21, %v3111_v20  ;;  %v2588_v60 = vor.u32 %v3475_v53, %v2585_v54  ;;  %v2460_v17 = vor.u32 %v3443_v4, %v2457_v5  ;;  %v3439_v18 = vld [vmem:[#allocation6 + $0x6c] sm:$0xf] }
  0x95   :  { %1599 = vmatpush.bf16.msra.mxu0 %v2680_v31  ;;  %v2620_v31 = vor.u32 %v3483_v22, %v2617_v23  ;;  %v2967_v32 = vld [vmem:[#allocation6 + $0x488] sm:$0xf]  ;;  %v3573_v33 = vld [vmem:[#allocation6 + $0x494] sm:$0xf0]  ;;  %v2776_v42 = vor.u32 %v3525_v26, %v2775_v25  ;;  %v2441_v20 = vld [vmem:[#allocation6 + $0x78] sm:$0xf0] }
  0x96   :  { %1572 = vmatpush.bf16.msrb.mxu1 %v2408_v43  ;;  %1586 = vmatpush.bf16.msrb.mxu3 %v2536_v45  ;;  %v3095_v36 = vld [vmem:[#allocation6 + $0x588] sm:$0xf]  ;;  %v3605_v37 = vld [vmem:[#allocation6 + $0x594] sm:$0xf0]  ;;  %v2508_v43 = vor.u32 %v3455_v27, %v2505_v28  ;;  %v2489_v45 = vld [vmem:[#allocation6 + $0xd8] sm:$0xf0]  ;;  %v2968_v46 = vor.u32 %v3573_v33, %v2967_v32 }
  0x97   :  { %v3096_v47 = vor.u32 %v3605_v37, %v3095_v36  ;;  %v3569_v50 = vld [vmem:[#allocation6 + $0x474] sm:$0xf0]  ;;  %v3079_v51 = vld [vmem:[#allocation6 + $0x568] sm:$0xf]  ;;  %v2492_v55 = vor.u32 %v3451_v44, %v2489_v45  ;;  %v3519_v28 = vld [vmem:[#allocation6 + $0x2ec] sm:$0xf]  ;;  %v2444_v36 = vor.u32 %v3439_v18, %v2441_v20 }
  0x98   :  { %1610 = vmatpush.bf16.msra.mxu2 %v2856_v24  ;;  %v2792_v24 = vor.u32 %v3529_v11, %v2791_v10  ;;  %v3601_v52 = vld [vmem:[#allocation6 + $0x574] sm:$0xf0]  ;;  %v2935_v61 = vld [vmem:[#allocation6 + $0x448] sm:$0xf]  ;;  %v3463_v32 = vld [vmem:[#allocation6 + $0x12c] sm:$0xf] }
  0x99   :  { %1600 = vmatpush.bf16.msra.mxu0 %v2664_v49  ;;  %v2951_v49 = vld [vmem:[#allocation6 + $0x468] sm:$0xf]  ;;  %v3080_v59 = vor.u32 %v3601_v52, %v3079_v51  ;;  %v3561_v10 = vld [vmem:[#allocation6 + $0x434] sm:$0xf0]  ;;  %v2537_v33 = vld [vmem:[#allocation6 + $0x138] sm:$0xf0] }
  0x9a   :  { %1573 = vmatpush.bf16.msrb.mxu1 %v2392_v57  ;;  %1587 = vmatpush.bf16.msrb.mxu3 %v2520_v62  ;;  %v2473_v57 = vld [vmem:[#allocation6 + $0xb8] sm:$0xf0]  ;;  %v2952_v58 = vor.u32 %v3569_v50, %v2951_v49  ;;  %v3565_v62 = vld [vmem:[#allocation6 + $0x454] sm:$0xf0]  ;;  %v3047_v11 = vld [vmem:[#allocation6 + $0x528] sm:$0xf]  ;;  %v2540_v45 = vor.u32 %v3463_v32, %v2537_v33 }
  0x9b   :  { %v2903_v22 = vld [vmem:[#allocation6 + $0x408] sm:$0xf]  ;;  %v3557_v25 = vld [vmem:[#allocation6 + $0x414] sm:$0xf0]  ;;  %v2873_v49 = vld [vmem:[#allocation6 + $0x3d8] sm:$0xf0] }
  0x9c   :  { %1611 = vmatpush.bf16.msra.mxu2 %v2840_v38  ;;  %v3479_v38 = vld [vmem:[#allocation6 + $0x1ac] sm:$0xf]  ;;  %v3031_v26 = vld [vmem:[#allocation6 + $0x508] sm:$0xf]  ;;  %v3589_v27 = vld [vmem:[#allocation6 + $0x514] sm:$0xf0]  ;;  %v2904_v37 = vor.u32 %v3557_v25, %v2903_v22 }
  0x9d   :  { %1601 = vmatpush.bf16.msra.mxu0 %v2648_v1  ;;  %1574 = vmatmul.bf16.vlgmr.msrb.gmra.mxu1 %v3894_v35  ;;  %v2604_v48 = vor.u32 %v3479_v38, %v2601_v41  ;;  %v3471_v1 = vld [vmem:[#allocation6 + $0x16c] sm:$0xf]  ;;  %v2425_v41 = vld [vmem:[#allocation6 + $0x58] sm:$0xf0] }
  0x9e   :  { %1622 = vmatpush.bf16.msra.mxu1 %v3016_v63  ;;  %1636 = vmatpush.bf16.msra.mxu3 %v3144_v0  ;;  %v3063_v63 = vld [vmem:[#allocation6 + $0x548] sm:$0xf]  ;;  %v3597_v0 = vld [vmem:[#allocation6 + $0x554] sm:$0xf0]  ;;  %v2572_v8 = vor.u32 %v3471_v1, %v2569_v2  ;;  %v3435_v38 = vld [vmem:[#allocation6 + $0x4c] sm:$0xf] }
  0x9f   :  { %1588 = vmatmul.bf16.vlgmr.msrb.gmra.mxu3 %v3898_v40  ;;  %v3064_v7 = vor.u32 %v3597_v0, %v3063_v63  ;;  %v3459_v50 = vld [vmem:[#allocation6 + $0x10c] sm:$0xf]  ;;  %v2521_v51 = vld [vmem:[#allocation6 + $0x118] sm:$0xf0]  ;;  %v2428_v52 = vor.u32 %v3435_v38, %v2425_v41 }
  0xa0   :  { %1612 = vmatpush.bf16.msra.mxu2 %v2824_v56  ;;  %1602 = vmatmul.bf16.vlgmr.msra.gmra.mxu0 %v3892_v34  ;;  %v3447_v56 = vld [vmem:[#allocation6 + $0xac] sm:$0xf]  ;;  %v3145_v54 = vld [vmem:[#allocation6 + $0x5f8] sm:$0xf0] }
  0xa1   :  { %1657 = vmatpush.bf16.msrb.mxu0 %v3160_v6  ;;  %v2476_v3 = vor.u32 %v3447_v56, %v2473_v57  ;;  %v2936_v6 = vor.u32 %v3565_v62, %v2935_v61  ;;  %v3615_v53 = vld [vmem:[#allocation6 + $0x5ec] sm:$0xf]  ;;  %v2409_v56 = vld [vmem:[#allocation6 + $0x38] sm:$0xf0] }
  0xa2   :  { %1623 = vmatpush.bf16.msra.mxu1 %v3000_v12  ;;  %1637 = vmatpush.bf16.msra.mxu3 %v3128_v15  ;;  %v3593_v12 = vld [vmem:[#allocation6 + $0x534] sm:$0xf0]  ;;  %v3467_v15 = vld [vmem:[#allocation6 + $0x14c] sm:$0xf]  ;;  %v2729_v61 = vld [vmem:[#allocation6 + $0x2b8] sm:$0xf0]  ;;  %v3148_v62 = vor.u32 %v3615_v53, %v3145_v54 }
  0xa3   :  { %v3048_v23 = vor.u32 %v3593_v12, %v3047_v11  ;;  %v3543_v63 = vld [vmem:[#allocation6 + $0x3ac] sm:$0xf]  ;;  %v2857_v0 = vld [vmem:[#allocation6 + $0x3b8] sm:$0xf0] }
  0xa4   :  { %1613 = vmatpush.bf16.msra.mxu2 %v2808_v9  ;;  %v2919_v9 = vld [vmem:[#allocation6 + $0x428] sm:$0xf]  ;;  %v3611_v2 = vld [vmem:[#allocation6 + $0x5cc] sm:$0xf]  ;;  %v2393_v5 = vld [vmem:[#allocation6 + $0x18] sm:$0xf0] }
  0xa5   :  { %1678 = vmatpush.bf16.msra.mxu0 %v2636_v16  ;;  %v2553_v16 = vld [vmem:[#allocation6 + $0x158] sm:$0xf0]  ;;  %v2920_v21 = vor.u32 %v3561_v10, %v2919_v9  ;;  %v3427_v4 = vld [vmem:[#allocation6 + $0xc] sm:$0xf]  ;;  %v2860_v9 = vor.u32 %v3543_v63, %v2857_v0 }
  0xa6   :  { %1624 = vmatpush.bf16.msra.mxu1 %v2984_v29  ;;  %1638 = vmatpush.bf16.msra.mxu3 %v3112_v30  ;;  %v2761_v29 = vld [vmem:[#allocation6 + $0x2f8] sm:$0xf0]  ;;  %v3551_v30 = vld [vmem:[#allocation6 + $0x3ec] sm:$0xf] }
  0xa7   :  { %v3507_v10 = vld [vmem:[#allocation6 + $0x28c] sm:$0xf]  ;;  %v2713_v11 = vld [vmem:[#allocation6 + $0x298] sm:$0xf0] }
  0xa8   :  { %1614 = vmatpush.bf16.msra.mxu2 %v2792_v24  ;;  %v2556_v24 = vor.u32 %v3467_v15, %v2553_v16  ;;  %v3539_v15 = vld [vmem:[#allocation6 + $0x38c] sm:$0xf]  ;;  %v2841_v16 = vld [vmem:[#allocation6 + $0x398] sm:$0xf0] }
  0xa9   :  { %1679 = vmatpush.bf16.msra.mxu0 %v2620_v31  ;;  %v2889_v31 = vld [vmem:[#allocation6 + $0x3f8] sm:$0xf0]  ;;  %v3607_v18 = vld [vmem:[#allocation6 + $0x5ac] sm:$0xf]  ;;  %v2844_v25 = vor.u32 %v3539_v15, %v2841_v16 }
  0xaa   :  { %1625 = vmatpush.bf16.msra.mxu1 %v2968_v46  ;;  %1639 = vmatpush.bf16.msra.mxu3 %v3096_v47  ;;  %v2892_v44 = vor.u32 %v3551_v30, %v2889_v31  ;;  %v3515_v46 = vld [vmem:[#allocation6 + $0x2cc] sm:$0xf]  ;;  %v2745_v47 = vld [vmem:[#allocation6 + $0x2d8] sm:$0xf0] }
  0xab   :  { %v2748_v57 = vor.u32 %v3515_v46, %v2745_v47  ;;  %v3113_v20 = vld [vmem:[#allocation6 + $0x5b8] sm:$0xf0]  ;;  %v3579_v22 = vld [vmem:[#allocation6 + $0x4cc] sm:$0xf] }
  0xac   :  { %1615 = vmatpush.bf16.msra.mxu2 %v2776_v42  ;;  %v3032_v42 = vor.u32 %v3589_v27, %v3031_v26  ;;  %v3503_v26 = vld [vmem:[#allocation6 + $0x26c] sm:$0xf]  ;;  %v2697_v27 = vld [vmem:[#allocation6 + $0x278] sm:$0xf0] }
  0xad   :  { %1680 = vmatpush.bf16.msra.mxu0 %v2604_v48  ;;  %v3547_v48 = vld [vmem:[#allocation6 + $0x3cc] sm:$0xf]  ;;  %v2825_v30 = vld [vmem:[#allocation6 + $0x378] sm:$0xf0] }
  0xae   :  { %1626 = vmatpush.bf16.msra.mxu1 %v2952_v58  ;;  %1640 = vmatpush.bf16.msra.mxu3 %v3080_v59  ;;  %v2876_v58 = vor.u32 %v3547_v48, %v2873_v49  ;;  %v2524_v59 = vor.u32 %v3459_v50, %v2521_v51  ;;  %v3603_v31 = vld [vmem:[#allocation6 + $0x58c] sm:$0xf]  ;;  %v3097_v32 = vld [vmem:[#allocation6 + $0x598] sm:$0xf0] }
  0xaf   :  { %1616 = vmatmul.bf16.vlgmr.msra.gmra.mxu2 %v3896_v39  ;;  %v2985_v38 = vld [vmem:[#allocation6 + $0x4b8] sm:$0xf0]  ;;  %v3599_v46 = vld [vmem:[#allocation6 + $0x56c] sm:$0xf] }
  0xb0   :  { %1664 = vmatpush.bf16.msrb.mxu2 %v2508_v43  ;;  %3167 = vmatmul.msk.bf16.vlgmr.msrb.gmra.mxu0 %vm1366_vm0, %v3909_v13  ;;  %v2764_v43 = vor.u32 %v3519_v28, %v2761_v29  ;;  %v3116_v28 = vor.u32 %v3607_v18, %v3113_v20  ;;  %v3535_v29 = vld [vmem:[#allocation6 + $0x36c] sm:$0xf]  ;;  %v3081_v47 = vld [vmem:[#allocation6 + $0x578] sm:$0xf0] }
  0xb1   :  { %1681 = vmatpush.bf16.msra.mxu0 %v2588_v60  ;;  %v3511_v60 = vld [vmem:[#allocation6 + $0x2ac] sm:$0xf]  ;;  %v2828_v41 = vor.u32 %v3535_v29, %v2825_v30  ;;  %v2969_v51 = vld [vmem:[#allocation6 + $0x498] sm:$0xf0] }
  0xb2   :  { %1627 = vmatpush.bf16.msra.mxu1 %v2936_v6  ;;  %1641 = vmatpush.bf16.msra.mxu3 %v3064_v7  ;;  %v3583_v6 = vld [vmem:[#allocation6 + $0x4ec] sm:$0xf]  ;;  %v2732_v7 = vor.u32 %v3511_v60, %v2729_v61  ;;  %v2665_v54 = vld [vmem:[#allocation6 + $0x238] sm:$0xf0] }
  0xb3   :  { %v3571_v49 = vld [vmem:[#allocation6 + $0x48c] sm:$0xf]  ;;  %v2953_v61 = vld [vmem:[#allocation6 + $0x478] sm:$0xf0] }
  0xb4   :  { %1665 = vmatpush.bf16.msrb.mxu2 %v2492_v55  ;;  %v3431_v55 = vld [vmem:[#allocation6 + $0x2c] sm:$0xf]  ;;  %v2937_v16 = vld [vmem:[#allocation6 + $0x458] sm:$0xf0] }
  0xb5   :  { %1682 = vmatpush.bf16.msra.mxu0 %v2572_v8  ;;  %v2412_v1 = vor.u32 %v3431_v55, %v2409_v56  ;;  %v3017_v8 = vld [vmem:[#allocation6 + $0x4f8] sm:$0xf0]  ;;  %v3495_v53 = vld [vmem:[#allocation6 + $0x22c] sm:$0xf]  ;;  %v3084_v55 = vor.u32 %v3599_v46, %v3081_v47  ;;  %v3203_v47 = vld [vmem:[#allocation9 + $0x40] sm:$0xf] }
  0xb6   :  { %1628 = vmatpush.bf16.msra.mxu1 %v2920_v21  ;;  %1642 = vmatpush.bf16.msra.mxu3 %v3048_v23  ;;  %v3020_v21 = vor.u32 %v3583_v6, %v3017_v8  ;;  %v2716_v23 = vor.u32 %v3507_v10, %v2713_v11  ;;  %v3527_v56 = vld [vmem:[#allocation6 + $0x32c] sm:$0xf]  ;;  %v3637_v8 = vld [vmem:[#allocation9 + $0x74] sm:$0xf0] }
  0xb7   :  { %v3567_v60 = vld [vmem:[#allocation6 + $0x46c] sm:$0xf]  ;;  %v3049_v10 = vld [vmem:[#allocation6 + $0x538] sm:$0xf0] }
  0xb8   :  { %1666 = vmatpush.bf16.msrb.mxu2 %v2476_v3  ;;  %v3129_v3 = vld [vmem:[#allocation6 + $0x5d8] sm:$0xf0]  ;;  %v3491_v63 = vld [vmem:[#allocation6 + $0x20c] sm:$0xf]  ;;  %v2956_v11 = vor.u32 %v3567_v60, %v2953_v61 }
  0xb9   :  { %1683 = vmatpush.bf16.msra.mxu0 %v2556_v24  ;;  %v3132_v12 = vor.u32 %v3611_v2, %v3129_v3  ;;  %v3001_v24 = vld [vmem:[#allocation6 + $0x4d8] sm:$0xf0]  ;;  %v3523_v2 = vld [vmem:[#allocation6 + $0x30c] sm:$0xf] }
  0xba   :  { %1629 = vmatpush.bf16.msra.mxu1 %v2904_v37  ;;  %1643 = vmatpush.bf16.msra.mxu3 %v3032_v42  ;;  %v3004_v33 = vor.u32 %v3579_v22, %v3001_v24  ;;  %v2700_v37 = vor.u32 %v3503_v26, %v2697_v27  ;;  %v3499_v42 = vld [vmem:[#allocation6 + $0x24c] sm:$0xf]  ;;  %v2777_v3 = vld [vmem:[#allocation6 + $0x318] sm:$0xf0]  ;;  %v3219_v22 = vld [vmem:[#allocation9 + $0x60] sm:$0xf] }
  0xbb   :  { %v3619_v6 = vld [vmem:[#allocation6 + $0x60c] sm:$0xf]  ;;  %v3938_v27 = vld [vmem:[#allocation8] sm:$0xf]  ;;  %v2921_v30 = vld [vmem:[#allocation6 + $0x438] sm:$0xf0] }
  0xbc   :  { %1667 = vmatpush.bf16.msrb.mxu2 %v2460_v17  ;;  %v2396_v17 = vor.u32 %v3427_v4, %v2393_v5  ;;  %v3227_v5 = vld [vmem:[#allocation9 + $0x70] sm:$0xf]  ;;  %v3563_v15 = vld [vmem:[#allocation6 + $0x44c] sm:$0xf] }
  0xbd   :  { %1684 = vmatpush.bf16.msra.mxu0 %v2540_v45  ;;  %1630 = vmatmul.bf16.vlgmr.msra.gmra.mxu1 %v3912_v14  ;;  %v2809_v45 = vld [vmem:[#allocation6 + $0x358] sm:$0xf0]  ;;  %v3228_v20 = vor.u32 %v3637_v8, %v3227_v5  ;;  %v3587_v24 = vld [vmem:[#allocation6 + $0x50c] sm:$0xf]  ;;  %v2940_v26 = vor.u32 %v3563_v15, %v2937_v16  ;;  %v3259_v8 = vld [vmem:[#allocation9 + $0xb0] sm:$0xf] }
  0xbe   :  { %1692 = vmatpush.bf16.msrb.mxu1 %v2764_v43  ;;  %1706 = vmatpush.bf16.msrb.mxu3 %v2892_v44  ;;  %v2681_v43 = vld [vmem:[#allocation6 + $0x258] sm:$0xf0]  ;;  %v3531_v44 = vld [vmem:[#allocation6 + $0x34c] sm:$0xf] }
  0xbf   :  { %1644 = vmatmul.bf16.vlgmr.msra.gmra.mxu3 %v3915_v19  ;;  %v2684_v50 = vor.u32 %v3499_v42, %v2681_v43  ;;  %v3559_v29 = vld [vmem:[#allocation6 + $0x42c] sm:$0xf]  ;;  %v2905_v43 = vld [vmem:[#allocation6 + $0x418] sm:$0xf0] }
  0xc0   :  { %1668 = vmatpush.bf16.msrb.mxu2 %v2444_v36  ;;  %v3575_v36 = vld [vmem:[#allocation6 + $0x4ac] sm:$0xf] }
  0xc1   :  { %1685 = vmatpush.bf16.msra.mxu0 %v2524_v59  ;;  %v2988_v48 = vor.u32 %v3575_v36, %v2985_v38  ;;  %v2972_v59 = vor.u32 %v3571_v49, %v2969_v51  ;;  %v3211_v36 = vld [vmem:[#allocation9 + $0x50] sm:$0xf]  ;;  %v378_v38 = vperm.slane %v3938_v27, 0  ;;  %v3555_v42 = vld [vmem:[#allocation6 + $0x40c] sm:$0xf] }
  0xc2   :  { %1693 = vmatpush.bf16.msrb.mxu1 %v2748_v57  ;;  %1707 = vmatpush.bf16.msrb.mxu3 %v2876_v58  ;;  %v3595_v57 = vld [vmem:[#allocation6 + $0x54c] sm:$0xf]  ;;  %v3065_v58 = vld [vmem:[#allocation6 + $0x558] sm:$0xf0]  ;;  %v3283_v51 = vld [vmem:[#allocation9 + $0xe0] sm:$0xf] }
  0xc3   :  { %v3068_v4 = vor.u32 %v3595_v57, %v3065_v58  ;;  %v3649_v57 = vld [vmem:[#allocation9 + $0xd4] sm:$0xf0] }
  0xc4   :  { %1669 = vmatpush.bf16.msrb.mxu2 %v2428_v52  ;;  %1686 = vmatmul.bf16.vlgmr.msra.gmra.mxu0 %v3898_v40  ;;  %v3100_v40 = vor.u32 %v3603_v31, %v3097_v32  ;;  %v2812_v52 = vor.u32 %v3531_v44, %v2809_v45  ;;  %v3653_v45 = vld [vmem:[#allocation9 + $0xf4] sm:$0xf0] }
  0xc5   :  { %1734 = vmatpush.bf16.msrb.mxu0 %v3148_v62  ;;  %v2668_v62 = vor.u32 %v3495_v53, %v2665_v54  ;;  %v3275_v54 = vld [vmem:[#allocation9 + $0xd0] sm:$0xf] }
  0xc6   :  { %1694 = vmatpush.bf16.msrb.mxu1 %v2732_v7  ;;  %1708 = vmatpush.bf16.msrb.mxu3 %v2860_v9  ;;  %v3161_v7 = vld [vmem:[#allocation6 + $0x618] sm:$0xf0]  ;;  %v3591_v9 = vld [vmem:[#allocation6 + $0x52c] sm:$0xf]  ;;  %v3276_v61 = vor.u32 %v3649_v57, %v3275_v54  ;;  %v3630_v54 = vld [vmem:[#allocation9 + $0x44] sm:$0xf] }
  0xc7   :  { %v3164_v18 = vor.u32 %v3619_v6, %v3161_v7  ;;  %v3205_v57 = vld [vmem:[#allocation9 + $0x48] sm:$0xf0] }
  0xc8   :  { %1670 = vmatpush.bf16.msrb.mxu2 %v2412_v1  ;;  %v2649_v1 = vld [vmem:[#allocation6 + $0x218] sm:$0xf0] }
  0xc9   :  { %1735 = vmatpush.bf16.msrb.mxu0 %v3132_v12  ;;  %v2652_v12 = vor.u32 %v3491_v63, %v2649_v1  ;;  %v3267_v63 = vld [vmem:[#allocation9 + $0xc0] sm:$0xf] }
  0xca   :  { %1695 = vmatpush.bf16.msrb.mxu1 %v2716_v23  ;;  %1709 = vmatpush.bf16.msrb.mxu3 %v2844_v25  ;;  %v3635_v23 = vld [vmem:[#allocation9 + $0x64] sm:$0xf0]  ;;  %v3033_v25 = vld [vmem:[#allocation6 + $0x518] sm:$0xf0]  ;;  %v3187_v1 = vld [vmem:[#allocation9 + $0x20] sm:$0xf] }
  0xcb   :  { %v3220_v32 = vor.u32 %v3635_v23, %v3219_v22  ;;  %v3643_v22 = vld [vmem:[#allocation9 + $0xa4] sm:$0xf0] }
  0xcc   :  { %1671 = vmatpush.bf16.msrb.mxu2 %v2396_v17  ;;  %v2780_v17 = vor.u32 %v3523_v2, %v2777_v3  ;;  %v3627_v2 = vld [vmem:[#allocation9 + $0x24] sm:$0xf0] }
  0xcd   :  { %1736 = vmatpush.bf16.msrb.mxu0 %v3116_v28  ;;  %v1379_v28 = vpop.f32.mrf.mxu0  ;;  %v3188_v7 = vor.u32 %v3627_v2, %v3187_v1 }
  0xce   :  { %1696 = vmatpush.bf16.msrb.mxu1 %v2700_v37  ;;  %1710 = vmatpush.bf16.msrb.mxu3 %v2828_v41  ;;  %v1393_v31 = vpop.f32.mrf.mxu1  ;;  %v3633_v37 = vld [vmem:[#allocation9 + $0x54] sm:$0xf0]  ;;  %v2924_v41 = vor.u32 %v3559_v29, %v2921_v30 }
  0xcf   :  { %1672 = vmatmul.bf16.vlgmr.msrb.gmra.mxu2 %v3894_v35  ;;  %v2793_v35 = vld [vmem:[#allocation6 + $0x338] sm:$0xf0]  ;;  %v3212_v44 = vor.u32 %v3633_v37, %v3211_v36 }
  0xd0   :  { %1720 = vmatpush.bf16.msra.mxu2 %v3020_v21  ;;  %v2796_v0 = vor.u32 %v3527_v56, %v2793_v35  ;;  %v3052_v21 = vor.u32 %v3591_v9, %v3049_v10  ;;  %v3195_v56 = vld [vmem:[#allocation9 + $0x30] sm:$0xf]  ;;  %v3629_v35 = vld [vmem:[#allocation9 + $0x34] sm:$0xf0] }
  0xd1   :  { %1737 = vmatpush.bf16.msrb.mxu0 %v3100_v40  ;;  %v3291_v40 = vld [vmem:[#allocation9 + $0xf0] sm:$0xf] }
  0xd2   :  { %1697 = vmatpush.bf16.msrb.mxu1 %v2684_v50  ;;  %1711 = vmatpush.bf16.msrb.mxu3 %v2812_v52  ;;  %v1407_v46 = vpop.f32.mrf.mxu2  ;;  %v3292_v49 = vor.u32 %v3653_v45, %v3291_v40  ;;  %v2908_v50 = vor.u32 %v3555_v42, %v2905_v43  ;;  %v3651_v52 = vld [vmem:[#allocation9 + $0xe4] sm:$0xf0]  ;;  %v3179_v10 = vld [vmem:[#allocation9 + $0x10] sm:$0xf]  ;;  %v3221_v42 = vld [vmem:[#allocation9 + $0x68] sm:$0xf0] }
  0xd3   :  { %v3284_v53 = vor.u32 %v3651_v52, %v3283_v51  ;;  %v1421_v60 = vpop.f32.mrf.mxu3  ;;  %v3243_v43 = vld [vmem:[#allocation9 + $0x90] sm:$0xf]  ;;  %v3641_v40 = vld [vmem:[#allocation9 + $0x94] sm:$0xf0]  ;;  %v3235_v51 = vld [vmem:[#allocation9 + $0x80] sm:$0xf] }
  0xd4   :  { %1721 = vmatpush.bf16.msra.mxu2 %v3004_v33  ;;  %v3036_v33 = vor.u32 %v3587_v24, %v3033_v25  ;;  %v3171_v24 = vld [vmem:[#allocation9] sm:$0xf]  ;;  %v3623_v25 = vld [vmem:[#allocation9 + $0x4] sm:$0xf0] }
  0xd5   :  { %1738 = vmatpush.bf16.msrb.mxu0 %v3084_v55  ;;  %v1381_v55 = vpop.f32.mrf.mxu0  ;;  %v3639_v52 = vld [vmem:[#allocation9 + $0x84] sm:$0xf0] }
  0xd6   :  { %1698 = vmatpush.bf16.msrb.mxu1 %v2668_v62  ;;  %1712 = vmatpush.bf16.msrb.mxu3 %v2796_v0  ;;  %v1382_v62 = vadd.f32 %v1381_v55, %v378_v38  ;;  %v3647_v0 = vld [vmem:[#allocation9 + $0xc4] sm:$0xf0]  ;;  %v3236_v55 = vor.u32 %v3639_v52, %v3235_v51  ;;  %v3640_v51 = vld [vmem:[#allocation9 + $0x94] sm:$0xf]  ;;  %v3245_v52 = vld [vmem:[#allocation9 + $0x98] sm:$0xf0] }
  0xd7   :  { %v3268_v5 = vor.u32 %v3647_v0, %v3267_v63  ;;  %v379_v0 = vperm.slane %v3938_v27, 1 }
  0xd8   :  { %1722 = vmatpush.bf16.msra.mxu2 %v2988_v48  ;;  %v3631_v48 = vld [vmem:[#allocation9 + $0x44] sm:$0xf0] }
  0xd9   :  { %1739 = vmatpush.bf16.msrb.mxu0 %v3068_v4 }
  0xda   :  { %1699 = vmatpush.bf16.msrb.mxu1 %v2652_v12  ;;  %1713 = vmatpush.bf16.msrb.mxu3 %v2780_v17  ;;  %v1409_v4 = vpop.f32.mrf.mxu2  ;;  %v3645_v12 = vld [vmem:[#allocation9 + $0xb4] sm:$0xf0] }
  0xdb   :  { %v1423_v23 = vpop.f32.mrf.mxu3 }
  0xdc   :  { %1723 = vmatpush.bf16.msra.mxu2 %v2972_v59  ;;  %v1395_v59 = vpop.f32.mrf.mxu1 }
  0xdd   :  { %1740 = vmatpush.bf16.msrb.mxu0 %v3052_v21  ;;  %1700 = vmatmul.bf16.vlgmr.msrb.gmra.mxu1 %v3892_v34  ;;  %v1380_v34 = vadd.f32 %v1379_v28, %v378_v38  ;;  %v1396_v6 = vadd.f32 %v1395_v59, %v1382_v62  ;;  %v3251_v21 = vld [vmem:[#allocation9 + $0xa0] sm:$0xf]  ;;  %v3229_v28 = vld [vmem:[#allocation9 + $0x78] sm:$0xf0]  ;;  %v3285_v62 = vld [vmem:[#allocation9 + $0xe8] sm:$0xf0] }
  0xde   :  { %1755 = vmatpush.bf16.msra.mxu1 %v3164_v18  ;;  %2180 = vmatpush.bf16.msra.mxu3 %v3228_v20 }
  0xdf   :  { %1714 = vmatmul.bf16.vlgmr.msrb.gmra.mxu3 %v3896_v39  ;;  %v3204_v39 = vor.u32 %v3631_v48, %v3203_v47  ;;  %v1394_v58 = vadd.f32 %v1393_v31, %v1380_v34  ;;  %v1410_v17 = vadd.f32 %v1409_v4, %v1396_v6  ;;  %v3213_v34 = vld [vmem:[#allocation9 + $0x58] sm:$0xf0] }
  0xe0   :  { %1724 = vmatpush.bf16.msra.mxu2 %v2956_v11  ;;  %v3625_v11 = vld [vmem:[#allocation9 + $0x14] sm:$0xf0]  ;;  %v3197_v6 = vld [vmem:[#allocation9 + $0x38] sm:$0xf0] }
  0xe1   :  { %1741 = vmatpush.bf16.msrb.mxu0 %v3036_v33  ;;  %v1408_v3 = vadd.f32 %v1407_v46, %v1394_v58  ;;  %v3180_v20 = vor.u32 %v3625_v11, %v3179_v10  ;;  %v1424_v30 = vadd.f32 %v1423_v23, %v1410_v17  ;;  %v3244_v46 = vor.u32 %v3641_v40, %v3243_v43  ;;  %v3293_v58 = vld [vmem:[#allocation9 + $0xf8] sm:$0xf0]  ;;  %v3648_v10 = vld [vmem:[#allocation9 + $0xd4] sm:$0xf]  ;;  %v3626_v17 = vld [vmem:[#allocation9 + $0x24] sm:$0xf] }
  0xe2   :  { %2181 = vmatpush.bf16.msra.mxu3 %v3220_v32  ;;  %2194 = vmatpush.bf16.msrb.mxu1 %v3292_v49  ;;  %v3172_v32 = vor.u32 %v3623_v25, %v3171_v24  ;;  %v3632_v49 = vld [vmem:[#allocation9 + $0x54] sm:$0xf]  ;;  %v3277_v11 = vld [vmem:[#allocation9 + $0xd8] sm:$0xf0]  ;;  %v3253_v43 = vld [vmem:[#allocation9 + $0xa8] sm:$0xf0] }
  0xe3   :  { %v1422_v15 = vadd.f32 %v1421_v60, %v1408_v3  ;;  %v1477_v47 = vpop.f32.mrf.mxu3  ;;  %v3208_v3 = vor.u32 %v3630_v54, %v3205_v57  ;;  %v3644_v25 = vld [vmem:[#allocation9 + $0xb4] sm:$0xf]  ;;  %v3248_v54 = vor.u32 %v3640_v51, %v3245_v52 }
  0xe4   :  { %1725 = vmatpush.bf16.msra.mxu2 %v2940_v26  ;;  %1742 = vmatmul.bf16.vlgmr.msrb.gmra.mxu0 %v3915_v19  ;;  %v3196_v19 = vor.u32 %v3629_v35, %v3195_v56  ;;  %v1435_v9 = vpop.f32.mrf.mxu0  ;;  %v3636_v26 = vld [vmem:[#allocation9 + $0x74] sm:$0xf]  ;;  %v3216_v35 = vor.u32 %v3632_v49, %v3213_v34 }
  0xe5   :  { %v1449_v16 = vpop.f32.mrf.mxu1  ;;  %v1436_v18 = vadd.f32 %v1435_v9, %v1422_v15  ;;  %v3232_v36 = vor.u32 %v3636_v26, %v3229_v28  ;;  %v3652_v56 = vld [vmem:[#allocation9 + $0xf4] sm:$0xf]  ;;  %v1478_v9 = vadd.f32 %v1477_v47, %v379_v0  ;;  %v3280_v15 = vor.u32 %v3648_v10, %v3277_v11  ;;  %v3261_v26 = vld [vmem:[#allocation9 + $0xb8] sm:$0xf0]  ;;  %v3669_v28 = vld [vmem:[#allocation9 + $0x174] sm:$0xf0] }
  0xe6   :  { %2182 = vmatpush.bf16.msra.mxu3 %v3212_v44  ;;  %2195 = vmatpush.bf16.msrb.mxu1 %v3284_v53  ;;  %v3296_v60 = vor.u32 %v3652_v56, %v3293_v58  ;;  %v3638_v56 = vld [vmem:[#allocation9 + $0x84] sm:$0xf]  ;;  %v3237_v58 = vld [vmem:[#allocation9 + $0x88] sm:$0xf0] }
  0xe7   :  { %v1450_v31 = vadd.f32 %v1449_v16, %v1436_v18  ;;  %v3646_v16 = vld [vmem:[#allocation9 + $0xc4] sm:$0xf]  ;;  %v3189_v18 = vld [vmem:[#allocation9 + $0x28] sm:$0xf0] }
  0xe8   :  { %1726 = vmatpush.bf16.msra.mxu2 %v2924_v41  ;;  %v3634_v41 = vld [vmem:[#allocation9 + $0x64] sm:$0xf]  ;;  %v3192_v24 = vor.u32 %v3626_v17, %v3189_v18 }
  0xe9   :  { %v3224_v48 = vor.u32 %v3634_v41, %v3221_v42  ;;  %v3642_v42 = vld [vmem:[#allocation9 + $0xa4] sm:$0xf] }
  0xea   :  { %2183 = vmatpush.bf16.msra.mxu3 %v3204_v39  ;;  %2196 = vmatpush.bf16.msrb.mxu1 %v3276_v61  ;;  %v1463_v29 = vpop.f32.mrf.mxu2  ;;  %v3650_v61 = vld [vmem:[#allocation9 + $0xe4] sm:$0xf]  ;;  %v3256_v47 = vor.u32 %v3642_v42, %v3253_v43  ;;  %v380_v42 = vperm.slane %v3938_v27, 2  ;;  %v3419_v43 = vld [vmem:[#allocation9 + $0x1f0] sm:$0xf] }
  0xeb   :  { %v1464_v44 = vadd.f32 %v1463_v29, %v1450_v31  ;;  %v3288_v1 = vor.u32 %v3650_v61, %v3285_v62  ;;  %v3181_v31 = vld [vmem:[#allocation9 + $0x18] sm:$0xf0] }
  0xec   :  { %1727 = vmatpush.bf16.msra.mxu2 %v2908_v50  ;;  %v1437_v33 = vpop.f32.mrf.mxu0 }
  0xed   :  { %3168 = vmatmul.msk.bf16.vlgmr.msra.gmra.mxu1 %vm1366_vm0, %v3909_v13  ;;  %v3252_v13 = vor.u32 %v3643_v22, %v3251_v21  ;;  %v1438_v37 = vadd.f32 %v1437_v33, %v1424_v30  ;;  %v1451_v38 = vpop.f32.mrf.mxu1  ;;  %v1770_v39 = vmul.f32 0.2, %v1464_v44  ;;  %vm1762_vm1 = vcmp.ge.f32.partialorder %v1464_v44, 0.0  ;;  %v3355_v22 = vld [vmem:[#allocation9 + $0x170] sm:$0xf] }
  0xee   :  { %2184 = vmatpush.bf16.msra.mxu3 %v3196_v19  ;;  %2197 = vmatpush.bf16.msrb.mxu1 %v3268_v5  ;;  %v3628_v5 = vld [vmem:[#allocation9 + $0x34] sm:$0xf]  ;;  %vm2360_vm0 = vcmask 122880  }
  0xef   :  { %1728 = vmatmul.bf16.vlgmr.msra.gmra.mxu2 %v3912_v14  ;;  %v3260_v14 = vor.u32 %v3645_v12, %v3259_v8  ;;  %v1452_v45 = vadd.f32 %v1451_v38, %v1438_v37  ;;  %v1778_v19 = vsel %vm1762_vm1, %v1464_v44, %v1770_v39  ;;  %v1479_v8 = vpop.f32.mrf.mxu3  ;;  %v3200_v12 = vor.u32 %v3628_v5, %v3197_v6  ;;  %v3624_v30 = vld [vmem:[#allocation9 + $0x14] sm:$0xf]  ;;  %v3622_v44 = vld [vmem:[#allocation9 + $0x4] sm:$0xf]  ;;  %v3347_v39 = vld [vmem:[#allocation9 + $0x160] sm:$0xf] }
  0xf0   :  { %v1480_v29 = vadd.f32 %v1479_v8, %v379_v0  ;;  %v3264_v37 = vor.u32 %v3644_v25, %v3261_v26  ;;  %v3184_v41 = vor.u32 %v3624_v30, %v3181_v31  ;;  %v3240_v0 = vor.u32 %v3638_v56, %v3237_v58  ;;  %v3661_v8 = vld [vmem:[#allocation9 + $0x134] sm:$0xf0]  ;;  %v3299_v26 = vld [vmem:[#allocation9 + $0x100] sm:$0xf]  ;;  %v3357_v31 = vld [vmem:[#allocation9 + $0x178] sm:$0xf0] }
  0xf1   :  { %v3660_v56 = vld [vmem:[#allocation9 + $0x134] sm:$0xf] }
  0xf2   :  { %2185 = vmatpush.bf16.msra.mxu3 %v3188_v7  ;;  %2198 = vmatpush.bf16.msrb.mxu1 %v3260_v14  ;;  %v1465_v50 = vpop.f32.mrf.mxu2  ;;  %v3269_v14 = vld [vmem:[#allocation9 + $0xc8] sm:$0xf0] }
  0xf3   :  { %v1466_v53 = vadd.f32 %v1465_v50, %v1452_v45  ;;  %v3272_v21 = vor.u32 %v3646_v16, %v3269_v14  ;;  %v3173_v45 = vld [vmem:[#allocation9 + $0x8] sm:$0xf0]  ;;  %v3315_v14 = vld [vmem:[#allocation9 + $0x120] sm:$0xf] }
  0xf5   :  { %vm1766_vm2 = vcmp.ge.f32.partialorder %v1466_v53, 0.0  ;;  %v1774_v59 = vmul.f32 0.2, %v1466_v53 }
  0xf6   :  { %2186 = vmatpush.bf16.msra.mxu3 %v3180_v20  ;;  %2199 = vmatpush.bf16.msrb.mxu1 %v3252_v13 }
  0xf7   :  { %v1782_v63 = vsel %vm1766_vm2, %v1466_v53, %v1774_v59  ;;  %v3339_v59 = vld [vmem:[#allocation9 + $0x150] sm:$0xf] }
  0xf8   :  { %v3948_v2 = vpack.c.bf16 %v1782_v63, %v1778_v19 }
  0xf9   :  { %v1505_v4 = vpop.f32.mrf.mxu0 }
  0xfa   :  { %2187 = vmatpush.bf16.msra.mxu3 %v3172_v32  ;;  %2200 = vmatpush.bf16.msrb.mxu1 %v3244_v46  ;;  %v1491_v7 = vpop.f32.mrf.mxu2  ;;  %v1519_v23 = vpop.f32.mrf.mxu1  ;;  %v3356_v32 = vor.u32 %v3669_v28, %v3355_v22  ;;  %v3307_v22 = vld [vmem:[#allocation9 + $0x110] sm:$0xf]  ;;  %v3655_v28 = vld [vmem:[#allocation9 + $0x104] sm:$0xf0] }
  0xfb   :  { %v1492_v20 = vadd.f32 %v1491_v7, %v1478_v9  ;;  %v3323_v7 = vld [vmem:[#allocation9 + $0x130] sm:$0xf]  ;;  %v3300_v30 = vor.u32 %v3655_v28, %v3299_v26 }
  0xfc   :  { %2208 = vmatpush.bf16.msrb.mxu2 %v3356_v32 }
  0xfd   :  { %2188 = vmatmul.bf16.vlgmr.msra.gmra.mxu3 %v3948_v2 }
  0xfe   :  { %2236 = vmatpush.bf16.msrb.mxu3 %v3232_v36  ;;  %2201 = vmatpush.bf16.msrb.mxu1 %v3236_v55  ;;  %v1506_v36 = vadd.f32 %v1505_v4, %v1492_v20  ;;  %v3667_v55 = vld [vmem:[#allocation9 + $0x164] sm:$0xf0] }
  0xff   :  { %v3348_v57 = vor.u32 %v3667_v55, %v3347_v39  ;;  %v3663_v4 = vld [vmem:[#allocation9 + $0x144] sm:$0xf0]  ;;  %v3681_v55 = vld [vmem:[#allocation9 + $0x1d4] sm:$0xf0] }
 0x100   :  { %v1520_v46 = vadd.f32 %v1519_v23, %v1506_v36  ;;  %v3657_v23 = vld [vmem:[#allocation9 + $0x114] sm:$0xf0]  ;;  %v3349_v36 = vld [vmem:[#allocation9 + $0x168] sm:$0xf0] }
 0x101   :  { %v1507_v13 = vpop.f32.mrf.mxu0  ;;  %2209 = vmatpush.bf16.msrb.mxu2 %v3348_v57  ;;  %v3308_v25 = vor.u32 %v3657_v23, %v3307_v22  ;;  %v3654_v23 = vld [vmem:[#allocation9 + $0x104] sm:$0xf] }
 0x102   :  { %2237 = vmatpush.bf16.msrb.mxu3 %v3224_v48  ;;  %2250 = vmatpush.bf16.msra.mxu1 %v3296_v60  ;;  %v1493_v33 = vpop.f32.mrf.mxu2  ;;  %v1533_v38 = vpop.f32.mrf.mxu3  ;;  %v3176_v48 = vor.u32 %v3622_v44, %v3173_v45  ;;  %v3665_v60 = vld [vmem:[#allocation9 + $0x154] sm:$0xf0]  ;;  %v3664_v45 = vld [vmem:[#allocation9 + $0x154] sm:$0xf] }
 0x103   :  { %v1494_v40 = vadd.f32 %v1493_v33, %v1480_v29  ;;  %v1521_v34 = vpop.f32.mrf.mxu1  ;;  %v1534_v53 = vadd.f32 %v1533_v38, %v1520_v46  ;;  %v3340_v19 = vor.u32 %v3665_v60, %v3339_v59  ;;  %v3668_v29 = vld [vmem:[#allocation9 + $0x174] sm:$0xf]  ;;  %v3666_v33 = vld [vmem:[#allocation9 + $0x164] sm:$0xf]  ;;  %v3341_v46 = vld [vmem:[#allocation9 + $0x158] sm:$0xf0] }
 0x104   :  { %v3360_v32 = vor.u32 %v3668_v29, %v3357_v31  ;;  %v3395_v60 = vld [vmem:[#allocation9 + $0x1c0] sm:$0xf] }
 0x105   :  { %v1508_v49 = vadd.f32 %v1507_v13, %v1494_v40  ;;  %2210 = vmatpush.bf16.msrb.mxu2 %v3340_v19  ;;  %v3685_v40 = vld [vmem:[#allocation9 + $0x1f4] sm:$0xf0] }
 0x106   :  { %2238 = vmatpush.bf16.msrb.mxu3 %v3216_v35  ;;  %2251 = vmatpush.bf16.msra.mxu1 %v3288_v1  ;;  %v3420_v44 = vor.u32 %v3685_v40, %v3419_v43 }
 0x107   :  { %v1522_v61 = vadd.f32 %v1521_v34, %v1508_v49  ;;  %v3683_v49 = vld [vmem:[#allocation9 + $0x1e4] sm:$0xf0]  ;;  %v3662_v34 = vld [vmem:[#allocation9 + $0x144] sm:$0xf] }
 0x108   :  { %2222 = vmatpush.bf16.msra.mxu0 %v3420_v44 }
 0x109   :  { %v1561_v50 = vpop.f32.mrf.mxu0 }
 0x10a   :  { %2239 = vmatpush.bf16.msrb.mxu3 %v3208_v3  ;;  %2252 = vmatpush.bf16.msra.mxu1 %v3280_v15  ;;  %v1535_v62 = vpop.f32.mrf.mxu3  ;;  %v3331_v3 = vld [vmem:[#allocation9 + $0x140] sm:$0xf] }
 0x10b   :  { %v1536_v1 = vadd.f32 %v1535_v62, %v1522_v61  ;;  %v3332_v6 = vor.u32 %v3663_v4, %v3331_v3  ;;  %v3679_v61 = vld [vmem:[#allocation9 + $0x1c4] sm:$0xf0]  ;;  %v3317_v3 = vld [vmem:[#allocation9 + $0x128] sm:$0xf0] }
 0x10d   :  { %2211 = vmatpush.bf16.msrb.mxu2 %v3332_v6 }
 0x10e   :  { %2240 = vmatpush.bf16.msrb.mxu3 %v3200_v12  ;;  %2253 = vmatpush.bf16.msra.mxu1 %v3272_v21  ;;  %v3324_v12 = vor.u32 %v3661_v8, %v3323_v7  ;;  %v3387_v7 = vld [vmem:[#allocation9 + $0x1b0] sm:$0xf]  ;;  %v3677_v8 = vld [vmem:[#allocation9 + $0x1b4] sm:$0xf0] }
 0x111   :  { %v1563_v10 = vpop.f32.mrf.mxu0  ;;  %2212 = vmatpush.bf16.msrb.mxu2 %v3324_v12  ;;  %v3309_v12 = vld [vmem:[#allocation9 + $0x118] sm:$0xf0] }
 0x112   :  { %2241 = vmatpush.bf16.msrb.mxu3 %v3192_v24  ;;  %2254 = vmatpush.bf16.msra.mxu1 %v3264_v37  ;;  %v1547_v35 = vpop.f32.mrf.mxu2  ;;  %v3352_v37 = vor.u32 %v3666_v33, %v3349_v36 }
 0x113   :  { %v1548_v63 = vadd.f32 %v1547_v35, %v1534_v53  ;;  %v3325_v35 = vld [vmem:[#allocation9 + $0x138] sm:$0xf0] }
 0x115   :  { %v1562_v5 = vadd.f32 %v1561_v50, %v1548_v63  ;;  %v3333_v50 = vld [vmem:[#allocation9 + $0x148] sm:$0xf0]  ;;  %v3328_v63 = vor.u32 %v3660_v56, %v3325_v35 }
 0x116   :  { %2242 = vmatpush.bf16.msrb.mxu3 %v3184_v41  ;;  %2255 = vmatpush.bf16.msra.mxu1 %v3256_v47  ;;  %v3411_v47 = vld [vmem:[#allocation9 + $0x1e0] sm:$0xf]  ;;  %v3336_v53 = vor.u32 %v3662_v34, %v3333_v50  ;;  %v3684_v34 = vld [vmem:[#allocation9 + $0x1f4] sm:$0xf]  ;;  %v3421_v50 = vld [vmem:[#allocation9 + $0x1f8] sm:$0xf0] }
 0x117   :  { %v1771_v15 = vmul.f32 0.2, %v1562_v5  ;;  %vm1763_vm3 = vcmp.ge.f32.partialorder %v1562_v5, 0.0  ;;  %v3412_v52 = vor.u32 %v3683_v49, %v3411_v47 }
 0x119   :  { %v1779_v20 = vsel %vm1763_vm3, %v1562_v5, %v1771_v15  ;;  %2223 = vmatpush.bf16.msra.mxu0 %v3412_v52  ;;  %v3396_v5 = vor.u32 %v3679_v61, %v3395_v60  ;;  %v3388_v15 = vor.u32 %v3677_v8, %v3387_v7  ;;  %v3424_v52 = vor.u32 %v3684_v34, %v3421_v50  ;;  %v3678_v61 = vld [vmem:[#allocation9 + $0x1c4] sm:$0xf] }
 0x11a   :  { %2243 = vmatpush.bf16.msrb.mxu3 %v3176_v48  ;;  %2256 = vmatpush.bf16.msra.mxu1 %v3248_v54  ;;  %v1549_v9 = vpop.f32.mrf.mxu2  ;;  %v1575_v13 = vpop.f32.mrf.mxu1  ;;  %v3344_v48 = vor.u32 %v3664_v45, %v3341_v46  ;;  %v3403_v54 = vld [vmem:[#allocation9 + $0x1d0] sm:$0xf]  ;;  %v3363_v45 = vld [vmem:[#allocation9 + $0x180] sm:$0xf]  ;;  %v3671_v46 = vld [vmem:[#allocation9 + $0x184] sm:$0xf0] }
 0x11b   :  { %v1550_v11 = vadd.f32 %v1549_v9, %v1536_v1  ;;  %v1576_v39 = vadd.f32 %v1575_v13, %v380_v42  ;;  %v3404_v57 = vor.u32 %v3681_v55, %v3403_v54  ;;  %v3658_v1 = vld [vmem:[#allocation9 + $0x124] sm:$0xf]  ;;  %v3364_v49 = vor.u32 %v3671_v46, %v3363_v45 }
 0x11c   :  { %v3320_v9 = vor.u32 %v3658_v1, %v3317_v3  ;;  %v381_v60 = vperm.slane %v3938_v27, 3  ;;  %v2304_v45 = vld [vmem:[%s3971_s5] sm:$0x3] }
 0x11d   :  { %2244 = vmatmul.bf16.vlgmr.msrb.gmra.mxu3 %v3948_v2  ;;  %v1564_v16 = vadd.f32 %v1563_v10, %v1550_v11  ;;  %v3659_v2 = vld [vmem:[#allocation9 + $0x124] sm:$0xf0]  ;;  %v1603_v38 = vpop.f32.mrf.mxu0  ;;  %2224 = vmatpush.bf16.msra.mxu0 %v3404_v57  ;;  %v3656_v11 = vld [vmem:[#allocation9 + $0x114] sm:$0xf]  ;;  %2310 = vst [vmem:[#allocation1] ss:$9 sm:$0xff] %v2304_v45 }
 0x11e   :  { %2257 = vmatpush.bf16.msra.mxu1 %v3240_v0  ;;  %v3316_v18 = vor.u32 %v3659_v2, %v3315_v14  ;;  %v3379_v2 = vld [vmem:[#allocation9 + $0x1a0] sm:$0xf]  ;;  %v3680_v57 = vld [vmem:[#allocation9 + $0x1d4] sm:$0xf] }
 0x11f   :  { %vm1767_vm4 = vcmp.ge.f32.partialorder %v1564_v16, 0.0  ;;  %v1775_v17 = vmul.f32 0.2, %v1564_v16 }
 0x120   :  { %2213 = vmatpush.bf16.msrb.mxu2 %v3316_v18 }
 0x121   :  { %v1783_v21 = vsel %vm1767_vm4, %v1564_v16, %v1775_v17  ;;  %2225 = vmatpush.bf16.msra.mxu0 %v3396_v5  ;;  %v3675_v17 = vld [vmem:[#allocation9 + $0x1a4] sm:$0xf0] }
 0x122   :  { %v1787_v24 = vpack.c.bf16 %v1783_v21, %v1779_v20  ;;  %v1589_v41 = vpop.f32.mrf.mxu3  ;;  %v1577_v51 = vpop.f32.mrf.mxu1  ;;  %v3312_v20 = vor.u32 %v3656_v11, %v3309_v12  ;;  %v3380_v26 = vor.u32 %v3675_v17, %v3379_v2  ;;  %v3672_v11 = vld [vmem:[#allocation9 + $0x194] sm:$0xf]  ;;  %v3373_v12 = vld [vmem:[#allocation9 + $0x198] sm:$0xf0] }
 0x123   :  { %v1590_v58 = vadd.f32 %v1589_v41, %v1576_v39  ;;  %v1578_v0 = vadd.f32 %v1577_v51, %v380_v42  ;;  %v3673_v41 = vld [vmem:[#allocation9 + $0x194] sm:$0xf0]  ;;  %v3682_v39 = vld [vmem:[#allocation9 + $0x1e4] sm:$0xf] }
 0x124   :  { %2202 = vmatmul.bf16.vlgmr.msrb.gmra.mxu1 %v1787_v24  ;;  %2214 = vmatpush.bf16.msrb.mxu2 %v3308_v25 }
 0x125   :  { %v1605_v59 = vpop.f32.mrf.mxu0  ;;  %v1604_v6 = vadd.f32 %v1603_v38, %v1590_v58  ;;  %2226 = vmatpush.bf16.msra.mxu0 %v3388_v15  ;;  %v3371_v38 = vld [vmem:[#allocation9 + $0x190] sm:$0xf]  ;;  %v3405_v58 = vld [vmem:[#allocation9 + $0x1d8] sm:$0xf0] }
 0x126   :  { %v3372_v42 = vor.u32 %v3673_v41, %v3371_v38 }
 0x128   :  { %2215 = vmatpush.bf16.msrb.mxu2 %v3300_v30 }
 0x129   :  { %2227 = vmatpush.bf16.msra.mxu0 %v3380_v26  ;;  %v3365_v26 = vld [vmem:[#allocation9 + $0x188] sm:$0xf0] }
 0x12a   :  { %v1591_v19 = vpop.f32.mrf.mxu3 }
 0x12b   :  { %v1592_v10 = vadd.f32 %v1591_v19, %v1578_v0  ;;  %v3389_v0 = vld [vmem:[#allocation9 + $0x1b8] sm:$0xf0] }
 0x12c   :  { %2264 = vmatpush.bf16.msra.mxu2 %v3360_v32 }
 0x12d   :  { %v1659_v14 = vpop.f32.mrf.mxu0  ;;  %v1606_v21 = vadd.f32 %v1605_v59, %v1592_v10  ;;  %2228 = vmatpush.bf16.msra.mxu0 %v3372_v42  ;;  %v3408_v59 = vor.u32 %v3680_v57, %v3405_v58  ;;  %v3381_v10 = vld [vmem:[#allocation9 + $0x1a8] sm:$0xf0] }
 0x130   :  { %2265 = vmatpush.bf16.msra.mxu2 %v3352_v37 }
 0x131   :  { %2229 = vmatpush.bf16.msra.mxu0 %v3364_v49  ;;  %v1854_v49 = vld [vmem:[%s3970_s4] sm:$0x3] }
 0x132   :  { %v1617_v62 = vpop.f32.mrf.mxu2  ;;  %v1856_v34 = vperm.slane %v1854_v49, 0 }
 0x133   :  { %v1618_v16 = vadd.f32 %v1617_v62, %v1604_v6  ;;  %v3397_v62 = vld [vmem:[#allocation9 + $0x1c8] sm:$0xf0] }
 0x134   :  { %2258 = vmatmul.bf16.vlgmr.msra.gmra.mxu1 %v1787_v24  ;;  %2266 = vmatpush.bf16.msra.mxu2 %v3344_v48  ;;  %v3301_v24 = vld [vmem:[#allocation9 + $0x108] sm:$0xf0]  ;;  %v3400_v19 = vor.u32 %v3678_v61, %v3397_v62 }
 0x135   :  { %v3304_v13 = vor.u32 %v3654_v23, %v3301_v24  ;;  %v1661_v36 = vpop.f32.mrf.mxu0  ;;  %2278 = vmatpush.bf16.msrb.mxu0 %v3424_v52 }
 0x138   :  { %2267 = vmatpush.bf16.msra.mxu2 %v3336_v53  ;;  %v3413_v53 = vld [vmem:[#allocation9 + $0x1e8] sm:$0xf0] }
 0x139   :  { %v3416_v54 = vor.u32 %v3682_v39, %v3413_v53 }
 0x13a   :  { %v1631_v4 = vpop.f32.mrf.mxu1  ;;  %v1619_v25 = vpop.f32.mrf.mxu2 }
 0x13b   :  { %v1632_v22 = vadd.f32 %v1631_v4, %v1618_v16  ;;  %v1620_v30 = vadd.f32 %v1619_v25, %v1606_v21  ;;  %2279 = vmatpush.bf16.msrb.mxu0 %v3416_v54  ;;  %v3670_v25 = vld [vmem:[#allocation9 + $0x184] sm:$0xf] }
 0x13c   :  { %2268 = vmatpush.bf16.msra.mxu2 %v3328_v63  ;;  %v3676_v63 = vld [vmem:[#allocation9 + $0x1b4] sm:$0xf] }
 0x13d   :  { %v3392_v5 = vor.u32 %v3676_v63, %v3389_v0  ;;  %v1857_v0 = vperm.slane %v1854_v49, 1 }
 0x13f   :  { %2280 = vmatpush.bf16.msrb.mxu0 %v3408_v59 }
 0x140   :  { %2269 = vmatpush.bf16.msra.mxu2 %v3320_v9  ;;  %v3674_v9 = vld [vmem:[#allocation9 + $0x1a4] sm:$0xf] }
 0x141   :  { %v1687_v55 = vpop.f32.mrf.mxu0  ;;  %v3384_v27 = vor.u32 %v3674_v9, %v3381_v10 }
 0x142   :  { %v1645_v18 = vpop.f32.mrf.mxu3  ;;  %v1633_v29 = vpop.f32.mrf.mxu1 }
 0x143   :  { %v1646_v28 = vadd.f32 %v1645_v18, %v1632_v22  ;;  %v1634_v32 = vadd.f32 %v1633_v29, %v1620_v30  ;;  %2281 = vmatpush.bf16.msrb.mxu0 %v3400_v19 }
 0x144   :  { %2270 = vmatpush.bf16.msra.mxu2 %v3312_v20 }
 0x145   :  { %v1660_v31 = vadd.f32 %v1659_v14, %v1646_v28  ;;  %v3376_v14 = vor.u32 %v3672_v11, %v3373_v12  ;;  %v3368_v28 = vor.u32 %v3670_v25, %v3365_v26  ;;  %v2312_v25 = vld [vmem:[#allocation1 + $0x9] sm:$0xff] }
 0x147   :  { %v1772_v43 = vmul.f32 0.2, %v1660_v31  ;;  %vm1764_vm5 = vcmp.ge.f32.partialorder %v1660_v31, 0.0  ;;  %2282 = vmatpush.bf16.msrb.mxu0 %v3392_v5 }
 0x148   :  { %2271 = vmatpush.bf16.msra.mxu2 %v3304_v13 }
 0x149   :  { %v1780_v47 = vsel %vm1764_vm5, %v1660_v31, %v1772_v43  ;;  %v1689_v3 = vpop.f32.mrf.mxu0 }
 0x14a   :  { %v1647_v33 = vpop.f32.mrf.mxu3 }
 0x14b   :  { %v1648_v37 = vadd.f32 %v1647_v33, %v1634_v32  ;;  %2283 = vmatpush.bf16.msrb.mxu0 %v3384_v27 }
 0x14d   :  { %v1662_v40 = vadd.f32 %v1661_v36, %v1648_v37 }
 0x14f   :  { %vm1768_vm6 = vcmp.ge.f32.partialorder %v1662_v40, 0.0  ;;  %v1776_v44 = vmul.f32 0.2, %v1662_v40  ;;  %2284 = vmatpush.bf16.msrb.mxu0 %v3376_v14 }
 0x151   :  { %v1784_v48 = vsel %vm1768_vm6, %v1662_v40, %v1776_v44 }
 0x152   :  { %v1788_v51 = vpack.c.bf16 %v1784_v48, %v1780_v47  ;;  %v1673_v56 = vpop.f32.mrf.mxu2 }
 0x153   :  { %v1674_v1 = vadd.f32 %v1673_v56, %v381_v60  ;;  %2285 = vmatpush.bf16.msrb.mxu0 %v3368_v28  ;;  %v2308_v28 = vstv %s3972_s6 }
 0x154   :  { %2216 = vmatmul.bf16.vlgmr.msrb.gmra.mxu2 %v1788_v51 }
 0x155   :  { %v1688_v8 = vadd.f32 %v1687_v55, %v1674_v1 }
 0x15a   :  { %v1701_v35 = vpop.f32.mrf.mxu1  ;;  %v1675_v6 = vpop.f32.mrf.mxu2 }
 0x15b   :  { %v1676_v15 = vadd.f32 %v1675_v6, %v381_v60  ;;  %v1702_v16 = vadd.f32 %v1701_v35, %v1688_v8 }
 0x15d   :  { %v1690_v21 = vadd.f32 %v1689_v3, %v1676_v15  ;;  %v2311_v15 = vld [vmem:[#allocation1] sm:$0xff] }
 0x161   :  { %v1743_v17 = vpop.f32.mrf.mxu0 }
 0x162   :  { %v1703_v4 = vpop.f32.mrf.mxu1  ;;  %v1715_v7 = vpop.f32.mrf.mxu3 }
 0x163   :  { %v1716_v2 = vadd.f32 %v1715_v7, %v1702_v16  ;;  %v1704_v23 = vadd.f32 %v1703_v4, %v1690_v21 }
 0x164   :  { %2272 = vmatmul.bf16.vlgmr.msra.gmra.mxu2 %v1788_v51 }
 0x169   :  { %v1745_v33 = vpop.f32.mrf.mxu0 }
 0x16a   :  { %v1757_v20 = vpop.f32.mrf.mxu1  ;;  %v1717_v22 = vpop.f32.mrf.mxu3 }
 0x16b   :  { %v1718_v29 = vadd.f32 %v1717_v22, %v1704_v23 }
 0x172   :  { %v1729_v18 = vpop.f32.mrf.mxu2  ;;  %v1759_v36 = vpop.f32.mrf.mxu1 }
 0x173   :  { %v1730_v24 = vadd.f32 %v1729_v18, %v1716_v2 }
 0x175   :  { %v1744_v13 = vadd.f32 %v1743_v17, %v1730_v24 }
 0x177   :  { %v1758_v31 = vadd.f32 %v1757_v20, %v1744_v13 }
 0x179   :  { %v1773_v38 = vmul.f32 0.2, %v1758_v31  ;;  %vm1765_vm7 = vcmp.ge.f32.partialorder %v1758_v31, 0.0 }
 0x17a   :  { %v1731_v30 = vpop.f32.mrf.mxu2 }
 0x17b   :  { %v1732_v32 = vadd.f32 %v1731_v30, %v1718_v29  ;;  %v1781_v43 = vsel %vm1765_vm7, %v1758_v31, %v1773_v38 }
 0x17d   :  { %v1746_v37 = vadd.f32 %v1745_v33, %v1732_v32 }
 0x17f   :  { %v1760_v41 = vadd.f32 %v1759_v36, %v1746_v37 }
 0x180   :  { %v2189_v46 = vpop.f32.mrf.mxu3 }
 0x181   :  { %vm1769_vm8 = vcmp.ge.f32.partialorder %v1760_v41, 0.0  ;;  %v1777_v42 = vmul.f32 0.2, %v1760_v41  ;;  %v2190_v52 = vadd.f32 %v2189_v46, %v1856_v34 }
 0x183   :  { %v1785_v40 = vsel %vm1769_vm8, %v1760_v41, %v1777_v42 }
 0x184   :  { %v1789_v44 = vpack.c.bf16 %v1785_v40, %v1781_v43 }
 0x186   :  { %2230 = vmatmul.bf16.vlgmr.msra.gmra.mxu0 %v1789_v44 }
 0x188   :  { %v2191_v50 = vpop.f32.mrf.mxu3 }
 0x189   :  { %v2192_v55 = vadd.f32 %v2191_v50, %v1856_v34 }
 0x196   :  { %2286 = vmatmul.bf16.vlgmr.msrb.gmra.mxu0 %v1789_v44 }
 0x1a0   :  { %v2245_v58 = vpop.f32.mrf.mxu3 }
 0x1a1   :  { %v2203_v47 = vpop.f32.mrf.mxu1  ;;  %v2246_v6 = vadd.f32 %v2245_v58, %v1857_v0 }
 0x1a2   :  { %v2204_v54 = vadd.f32 %v2203_v47, %v2190_v52 }
 0x1a8   :  { %v2247_v7 = vpop.f32.mrf.mxu3 }
 0x1a9   :  { %v2205_v51 = vpop.f32.mrf.mxu1  ;;  %v2248_v11 = vadd.f32 %v2247_v7, %v1857_v0 }
 0x1aa   :  { %v2206_v35 = vadd.f32 %v2205_v51, %v2192_v55 }
 0x1b1   :  { %v2259_v60 = vpop.f32.mrf.mxu1 }
 0x1b2   :  { %v2260_v9 = vadd.f32 %v2259_v60, %v2246_v6 }
 0x1b9   :  { %v2261_v10 = vpop.f32.mrf.mxu1 }
 0x1ba   :  { %v2262_v16 = vadd.f32 %v2261_v10, %v2248_v11 }
 0x1d7   :  { %v2217_v48 = vpop.f32.mrf.mxu2 }
 0x1d8   :  { %v2218_v56 = vadd.f32 %v2217_v48, %v2204_v54 }
 0x1df   :  { %v2219_v39 = vpop.f32.mrf.mxu2 }
 0x1e0   :  { %v2220_v59 = vadd.f32 %v2219_v39, %v2206_v35 }
 0x1e7   :  { %v2273_v63 = vpop.f32.mrf.mxu2 }
 0x1e8   :  { %v2274_v27 = vadd.f32 %v2273_v63, %v2260_v9 }
 0x1ef   :  { %v2275_v12 = vpop.f32.mrf.mxu2 }
 0x1f0   :  { %v2276_v2 = vadd.f32 %v2275_v12, %v2262_v16 }
 0x203   :  { %v2231_v53 = vpop.f32.mrf.mxu0 }
 0x204   :  { %v2232_v57 = vadd.f32 %v2231_v53, %v2218_v56 }
 0x206   :  { %v2296_v62 = vmul.f32 0.2, %v2232_v57  ;;  %vm2292_vm9 = vcmp.ge.f32.partialorder %v2232_v57, 0.0 }
 0x208   :  { %v2300_v3 = vsel %vm2292_vm9, %v2232_v57, %v2296_v62 }
 0x20b   :  { %v2233_v61 = vpop.f32.mrf.mxu0 }
 0x20c   :  { %v2234_v19 = vadd.f32 %v2233_v61, %v2220_v59 }
 0x20e   :  { %vm2294_vm10 = vcmp.ge.f32.partialorder %v2234_v19, 0.0  ;;  %v2298_v1 = vmul.f32 0.2, %v2234_v19 }
 0x210   :  { %v2302_v4 = vsel %vm2294_vm10, %v2234_v19, %v2298_v1 }
 0x211   :  { %v2305_v5 = vpack.c.bf16 %v2302_v4, %v2300_v3 }
 0x213   :  { %v2287_v8 = vpop.f32.mrf.mxu0  ;;  %2322 = vmatpush.bf16.xpose.msra.mxu3 %v2305_v5 }
 0x214   :  { %v2288_v14 = vadd.f32 %v2287_v8, %v2274_v27 }
 0x216   :  { %v2297_v18 = vmul.f32 0.2, %v2288_v14  ;;  %vm2293_vm11 = vcmp.ge.f32.partialorder %v2288_v14, 0.0 }
 0x218   :  { %v2301_v22 = vsel %vm2293_vm11, %v2288_v14, %v2297_v18 }
 0x21a   :  { %2323 = vmatmul.bf16.vlgmr.msra.gmra.mxu3 %v2311_v15 }
 0x21b   :  { %v2289_v17 = vpop.f32.mrf.mxu0 }
 0x21c   :  { %v2290_v20 = vadd.f32 %v2289_v17, %v2276_v2 }
 0x21e   :  { %vm2295_vm12 = vcmp.ge.f32.partialorder %v2290_v20, 0.0  ;;  %v2299_v21 = vmul.f32 0.2, %v2290_v20 }
 0x220   :  { %v2303_v23 = vsel %vm2295_vm12, %v2290_v20, %v2299_v21 }
 0x221   :  { %v2306_v24 = vpack.c.bf16 %v2303_v23, %v2301_v22 }
 0x223   :  { %2335 = vmatpush.bf16.xpose.msrb.mxu1 %v2306_v24 }
 0x22a   :  { %2336 = vmatmul.bf16.vlgmr.msrb.gmra.mxu1 %v2312_v25 }
 0x29d   :  { %v2324_v26 = vpop.f32.mrf.mxu3 }
 0x29e   :  { %v2325_v29 = vadd.f32 %v2324_v26, %v2308_v28 }
 0x2a5   :  { %v2326_v13 = vpop.f32.mrf.mxu3 }
 0x2a7   :  { %v2337_v30 = vpop.f32.mrf.mxu1 }
 0x2a8   :  { %v2338_v31 = vadd.f32 %v2337_v30, %v2325_v29 }
 0x2aa   :  { %v3425_v32 = vmul.f32 -1.442695, %v2338_v31 }
 0x2ac   :  { %3697 = vpow2.f32 %v3425_v32 }
 0x2af   :  { %v2339_v33 = vpop.f32.mrf.mxu1 }
 0x2b2   :  { %v3698_v36 = vpop.eup %3697 }
 0x2b3   :  { %v2344_v37 = vadd.f32 1.0, %v3698_v36 }
 0x2b5   :  { %3699 = vrcp.f32 %v2344_v37  ;;  %v2356_v43 = vand.u32 2147483648, %v2344_v37  ;;  %v2354_v44 = vand.u32 2147483647, %v2344_v37  ;;  %vm2350_vm14 = vweird.f32 %v2344_v37 }
 0x2b7   :  { %v2357_v46 = vor.u32 1.1754944e-38, %v2356_v43  ;;  %vm2355_vm1 = vcmp.eq.f32.partialorder %v2354_v44, 8.507059e+37 }
 0x2bb   :  { %v3700_v38 = vpop.eup %3699 }
 0x2bc   :  { %v2346_v41 = vmul.f32 %v3700_v38, %v2344_v37  ;;  %vm2351_vm13 = vweird.f32 %v3700_v38 }
 0x2bd   :  { %vm2352_vm15 = vmor %vm2350_vm14, %vm2351_vm13 }
 0x2be   :  { %v2347_v42 = vsub.f32 1.0, %v2346_v41 }
 0x2c0   :  { %v2348_v40 = vmul.f32 %v3700_v38, %v2347_v42 }
 0x2c2   :  { %v2349_v45 = vadd.f32 %v3700_v38, %v2348_v40 }
 0x2c4   :  { %v2353_v47 = vsel %vm2352_vm15, %v3700_v38, %v2349_v45 }
 0x2c5   :  { %v2358_v48 = vsel %vm2355_vm1, %v2357_v46, %v2353_v47 }
 0x2c6   :  { %2361 = vst.msk [vmem:[#allocation11] sm:$0x1] %vm2360_vm0, %v2358_v48 }
 0x2c7   :  { %2372 = dma.vmem_to_hbm [thread:$0]  %s2368_s28, 16, %s2370_s30, [#allocation5]  }
 0x2c8   :  { %3827 = dma.done.wait [#allocation5], 16  }
 0x2c9   :  { %3828 = vsyncadd [#allocation5], 4294967280 }
 0x2ca   :  { %2377 = vsyncpa [#allocation4], 1 }
 0x2cb   :  { %2378 = vsyncpa [#allocation7], 1 }
 0x2cc   :  { %2379 = vsyncpa [#allocation10], 1 }
 0x2cd   :  { %2380 = vsyncpa [#allocation5], 1 }

</bundles_post_ra>
